<compile_context>
chip_gen: v6e
topology: v6e:2x2x1
jax: 0.10.0
libtpu: 0.0.40
codegen_flags: <defaults>
</compile_context>

<pallas_src>
import math

import jax
import jax.numpy as jnp
from jax.experimental import pallas as pl
from jax.experimental.pallas import tpu as pltpu

# ---------------------------- model hyper-params ----------------------------
SEQ = 8          # S
BATCH = 2        # N
D_MODEL = 32     # E
NHEAD = 4        # H
D_HEAD = D_MODEL // NHEAD
D_FF = 64        # dim_feedforward
NUM_LAYERS = 2
LN_EPS = 1e-5

TOKENS = SEQ * BATCH                    # 16 token rows, ordered (s, n)
OUT_LANES = 128                         # lane-dense output slab width
CHUNKS = OUT_LANES // D_MODEL           # 4 token rows packed per output row
OUT_ROWS = TOKENS // CHUNKS             # 4

VMEM_SPEC = pl.BlockSpec(memory_space=pltpu.MemorySpace.VMEM)


# ------------------------------ kernel helpers -------------------------------
def _layer_norm(y, g, b):
    mu = jnp.mean(y, axis=-1, keepdims=True)
    var = jnp.mean((y - mu) ** 2, axis=-1, keepdims=True)
    return (y - mu) * jax.lax.rsqrt(var + LN_EPS) * g + b


# ------------------------------ fused kernel ---------------------------------
def encoder_kernel(x_ref, bias_ref,
                   wqkv_ref, bqkv_ref, wo_ref, bo_ref,
                   w1_ref, b1_ref, w2_ref, b2_ref,
                   g1_ref, be1_ref, g2_ref, be2_ref,
                   gf_ref, bf_ref, o_ref):
    """Full TransformerEncoder forward: NUM_LAYERS post-norm layers + final LN.

    x_ref:    (TOKENS, D_MODEL) f32; rows are the row-major flattening of the
              (S, N, E) input, i.e. token i belongs to batch element (i % BATCH).
    bias_ref: (TOKENS, TOKENS) f32 additive mask: 0 within a batch element,
              -1e30 across batch elements (blocks cross-sequence attention).
    w*_ref:   weights stacked on a leading NUM_LAYERS dim; matmul weights are
              bf16 (fp32 MXU accumulation), biases / LN params are fp32.
    # TODO(synk): attn_mask / src_key_padding_mask of the PyTorch forward are
    # None here and not implemented; dropout is identity (eval mode).
    """
    x = x_ref[...]                                   # (T, E) fp32
    attn_bias = bias_ref[...]                        # (T, T) fp32

    for l in range(NUM_LAYERS):                      # static unroll over layers
        # ---- self-attention: joint QKV projection (2D matmul, bf16 -> f32) --
        qkv = jnp.dot(x.astype(jnp.bfloat16), wqkv_ref[l],
                      preferred_element_type=jnp.float32) + bqkv_ref[l]  # (T,3E)

        def split_heads(base):                       # -> (H, T, Dh) bf16
            return jnp.stack(
                [qkv[:, base + h * D_HEAD: base + (h + 1) * D_HEAD]
                 for h in range(NHEAD)], axis=0).astype(jnp.bfloat16)

        qh = split_heads(0)                          # Q pre-scaled by 1/sqrt(Dh)
        kh = split_heads(D_MODEL)
        vh = split_heads(2 * D_MODEL)

        # ---- batched-head attention, single softmax --------------------------
        scores = jnp.einsum('hqd,hkd->hqk', qh, kh,
                            preferred_element_type=jnp.float32) + attn_bias
        scores = scores - jnp.max(scores, axis=-1, keepdims=True)
        p = jnp.exp(scores)
        p = p * pl.reciprocal(jnp.sum(p, axis=-1, keepdims=True), approx=True)
        ctx = jnp.einsum('hqk,hkd->hqd', p.astype(jnp.bfloat16), vh,
                         preferred_element_type=jnp.float32)         # (H, T, Dh)
        attn = jnp.concatenate([ctx[h] for h in range(NHEAD)], axis=-1)  # (T, E)

        attn = jnp.dot(attn.astype(jnp.bfloat16), wo_ref[l],
                       preferred_element_type=jnp.float32) + bo_ref[l]

        # ---- residual + LayerNorm1 -------------------------------------------
        x1 = _layer_norm(x + attn, g1_ref[l], be1_ref[l])

        # ---- feed-forward (ReLU) ---------------------------------------------
        h1 = jnp.dot(x1.astype(jnp.bfloat16), w1_ref[l],
                     preferred_element_type=jnp.float32) + b1_ref[l]
        h1 = jnp.maximum(h1, 0.0)
        ff = jnp.dot(h1.astype(jnp.bfloat16), w2_ref[l],
                     preferred_element_type=jnp.float32) + b2_ref[l]

        # ---- residual + LayerNorm2 -------------------------------------------
        x = _layer_norm(x1 + ff, g2_ref[l], be2_ref[l])

    out = _layer_norm(x, gf_ref[...], bf_ref[...])                   # (T, E)

    # Lane-dense store: pack CHUNKS groups of OUT_ROWS token rows side by side
    # along the 128-lane axis (unmasked-friendly store; unpacked in the wrapper).
    o_ref[...] = jnp.concatenate(
        [out[c * OUT_ROWS:(c + 1) * OUT_ROWS, :] for c in range(CHUNKS)],
        axis=-1).astype(o_ref.dtype)


# ------------------------------ wrapper --------------------------------------
@jax.jit
def transformer_encoder(src_sne, stacked, final_norm, attn_bias):
    """src_sne: (S, N, E) like PyTorch TransformerEncoder (batch_first=False)."""
    x2d = src_sne.reshape(TOKENS, D_MODEL)           # free row-major flatten
    packed = pl.pallas_call(
        encoder_kernel,
        out_shape=jax.ShapeDtypeStruct((OUT_ROWS, OUT_LANES), jnp.float32),
        in_specs=[VMEM_SPEC] * 16,
        out_specs=VMEM_SPEC,
    )(x2d, attn_bias,
      stacked["w_qkv"], stacked["b_qkv"], stacked["w_o"], stacked["b_o"],
      stacked["w1"], stacked["b1"], stacked["w2"], stacked["b2"],
      stacked["g1"], stacked["be1"], stacked["g2"], stacked["be2"],
      final_norm["g"], final_norm["b"])
    # Unpack the lane-dense slab back to (S, N, E): cheap XLA slices/concat.
    flat = jnp.concatenate(
        [packed[:, c * D_MODEL:(c + 1) * D_MODEL] for c in range(CHUNKS)],
        axis=0)                                      # (TOKENS, E), token order
    return flat.reshape(SEQ, BATCH, D_MODEL)


# --------------------------- deterministic params -----------------------------
def make_layer_params(key):
    ks = jax.random.split(key, 6)
    bound_e = 1.0 / math.sqrt(D_MODEL)
    bound_f = 1.0 / math.sqrt(D_FF)
    scale = 1.0 / math.sqrt(D_HEAD)
    w_qkv = jax.random.uniform(ks[0], (D_MODEL, 3 * D_MODEL),
                               jnp.float32, -bound_e, bound_e)
    b_qkv = jnp.zeros((1, 3 * D_MODEL), jnp.float32)
    # Fold the attention scale 1/sqrt(D_HEAD) into the Q projection columns.
    w_qkv = w_qkv.at[:, :D_MODEL].multiply(scale)
    b_qkv = b_qkv.at[:, :D_MODEL].multiply(scale)
    return {
        "w_qkv": w_qkv,                               # (E, 3E), pre-transposed
        "b_qkv": b_qkv,                               # (1, 3E)
        "w_o":   jax.random.uniform(ks[1], (D_MODEL, D_MODEL),
                                    jnp.float32, -bound_e, bound_e),
        "b_o":   jnp.zeros((1, D_MODEL), jnp.float32),
        "w1":    jax.random.uniform(ks[2], (D_MODEL, D_FF),
                                    jnp.float32, -bound_e, bound_e),
        "b1":    jax.random.uniform(ks[3], (1, D_FF),
                                    jnp.float32, -bound_e, bound_e),
        "w2":    jax.random.uniform(ks[4], (D_FF, D_MODEL),
                                    jnp.float32, -bound_f, bound_f),
        "b2":    jax.random.uniform(ks[5], (1, D_MODEL),
                                    jnp.float32, -bound_f, bound_f),
        "g1":    jnp.ones((1, D_MODEL), jnp.float32),
        "be1":   jnp.zeros((1, D_MODEL), jnp.float32),
        "g2":    jnp.ones((1, D_MODEL), jnp.float32),
        "be2":   jnp.zeros((1, D_MODEL), jnp.float32),
    }


_MATMUL_WEIGHTS = ("w_qkv", "w_o", "w1", "w2")


def stack_layer_params(layer_params):
    """Stack per-layer params on a leading NUM_LAYERS dim; bf16 matmul weights."""
    stacked = {k: jnp.stack([p[k] for p in layer_params], axis=0)
               for k in layer_params[0]}
    for k in _MATMUL_WEIGHTS:            # bf16 MXU operands, fp32 accumulation
        stacked[k] = stacked[k].astype(jnp.bfloat16)
    return stacked


def make_attn_bias():
    """Additive mask blocking attention across batch elements (token i -> batch i % N)."""
    tok = jnp.arange(TOKENS)
    same = (tok[:, None] % BATCH) == (tok[None, :] % BATCH)
    return jnp.where(same, 0.0, -1e30).astype(jnp.float32)


if __name__ == "__main__":
    root = jax.random.PRNGKey(0)
    k_src, *k_layers = jax.random.split(root, 1 + NUM_LAYERS)

    # src: (S, N, E) matching PyTorch TransformerEncoder default layout.
    src = jax.random.normal(k_src, (SEQ, BATCH, D_MODEL), jnp.float32)

    layer_params = [make_layer_params(k) for k in k_layers]
    stacked = stack_layer_params(layer_params)
    final_norm = {"g": jnp.ones((1, D_MODEL), jnp.float32),
                  "b": jnp.zeros((1, D_MODEL), jnp.float32)}
    attn_bias = make_attn_bias()

    out = transformer_encoder(src, stacked, final_norm, attn_bias)
    out = jax.block_until_ready(out)
    assert out.shape == (SEQ, BATCH, D_MODEL)
    assert bool(jnp.all(jnp.isfinite(out)))
    print("KERNEL_OK")
</pallas_src>

<mosaic_0001>
module attributes {stable_mosaic.version = 11 : i64} {
  func.func @encoder_kernel(%arg0: memref<16x32xf32, #tpu.memory_space<vmem>>, %arg1: memref<16x16xf32, #tpu.memory_space<vmem>>, %arg2: memref<2x32x96xbf16, #tpu.memory_space<vmem>>, %arg3: memref<2x1x96xf32, #tpu.memory_space<vmem>>, %arg4: memref<2x32x32xbf16, #tpu.memory_space<vmem>>, %arg5: memref<2x1x32xf32, #tpu.memory_space<vmem>>, %arg6: memref<2x32x64xbf16, #tpu.memory_space<vmem>>, %arg7: memref<2x1x64xf32, #tpu.memory_space<vmem>>, %arg8: memref<2x64x32xbf16, #tpu.memory_space<vmem>>, %arg9: memref<2x1x32xf32, #tpu.memory_space<vmem>>, %arg10: memref<2x1x32xf32, #tpu.memory_space<vmem>>, %arg11: memref<2x1x32xf32, #tpu.memory_space<vmem>>, %arg12: memref<2x1x32xf32, #tpu.memory_space<vmem>>, %arg13: memref<2x1x32xf32, #tpu.memory_space<vmem>>, %arg14: memref<1x32xf32, #tpu.memory_space<vmem>>, %arg15: memref<1x32xf32, #tpu.memory_space<vmem>>, %arg16: memref<4x128xf32, #tpu.memory_space<vmem>>) attributes {dimension_semantics = [], scalar_prefetch = 0 : i64, scratch_operands = 0 : i64, tpu.core_type = #tpu.core_type<tc>} {
    %c0 = arith.constant 0 : index
    %c0_0 = arith.constant 0 : index
    %0 = vector.load %arg0[%c0, %c0_0] : memref<16x32xf32, #tpu.memory_space<vmem>>, vector<16x32xf32>
    %c0_1 = arith.constant 0 : index
    %c0_2 = arith.constant 0 : index
    %1 = vector.load %arg1[%c0_1, %c0_2] : memref<16x16xf32, #tpu.memory_space<vmem>>, vector<16x16xf32>
    %2 = arith.truncf %0 : vector<16x32xf32> to vector<16x32xbf16>
    %c0_3 = arith.constant 0 : index
    %c0_4 = arith.constant 0 : index
    %c0_5 = arith.constant 0 : index
    %3 = vector.load %arg2[%c0_3, %c0_4, %c0_5] : memref<2x32x96xbf16, #tpu.memory_space<vmem>>, vector<1x32x96xbf16>
    %4 = vector.shape_cast %3 : vector<1x32x96xbf16> to vector<32x96xbf16>
    %cst = arith.constant dense<0.000000e+00> : vector<16x96xf32>
    %5 = tpu.matmul %2, %4, %cst {dimension_numbers = #tpu.dot_dimension_numbers<[1], [0], [0], [1], [0, 0, 1, 1], [], []>} : vector<16x32xbf16>, vector<32x96xbf16>, vector<16x96xf32> -> vector<16x96xf32>
    %c0_6 = arith.constant 0 : index
    %c0_7 = arith.constant 0 : index
    %c0_8 = arith.constant 0 : index
    %6 = vector.load %arg3[%c0_6, %c0_7, %c0_8] : memref<2x1x96xf32, #tpu.memory_space<vmem>>, vector<1x1x96xf32>
    %7 = vector.shape_cast %6 : vector<1x1x96xf32> to vector<1x96xf32>
    %8 = vector.broadcast %7 : vector<1x96xf32> to vector<16x96xf32>
    %9 = arith.addf %5, %8 : vector<16x96xf32>
    %10 = vector.extract_strided_slice %9 {offsets = [0, 0], sizes = [16, 8], strides = [1, 1]} : vector<16x96xf32> to vector<16x8xf32>
    %11 = vector.extract_strided_slice %9 {offsets = [0, 8], sizes = [16, 8], strides = [1, 1]} : vector<16x96xf32> to vector<16x8xf32>
    %12 = vector.extract_strided_slice %9 {offsets = [0, 16], sizes = [16, 8], strides = [1, 1]} : vector<16x96xf32> to vector<16x8xf32>
    %13 = vector.extract_strided_slice %9 {offsets = [0, 24], sizes = [16, 8], strides = [1, 1]} : vector<16x96xf32> to vector<16x8xf32>
    %14 = vector.shape_cast %10 : vector<16x8xf32> to vector<1x16x8xf32>
    %15 = vector.shape_cast %11 : vector<16x8xf32> to vector<1x16x8xf32>
    %16 = vector.shape_cast %12 : vector<16x8xf32> to vector<1x16x8xf32>
    %17 = vector.shape_cast %13 : vector<16x8xf32> to vector<1x16x8xf32>
    %18 = tpu.concatenate %14, %15, %16, %17 in 0 : vector<1x16x8xf32>, vector<1x16x8xf32>, vector<1x16x8xf32>, vector<1x16x8xf32> -> vector<4x16x8xf32>
    %19 = arith.truncf %18 : vector<4x16x8xf32> to vector<4x16x8xbf16>
    %20 = vector.extract_strided_slice %9 {offsets = [0, 32], sizes = [16, 8], strides = [1, 1]} : vector<16x96xf32> to vector<16x8xf32>
    %21 = vector.extract_strided_slice %9 {offsets = [0, 40], sizes = [16, 8], strides = [1, 1]} : vector<16x96xf32> to vector<16x8xf32>
    %22 = vector.extract_strided_slice %9 {offsets = [0, 48], sizes = [16, 8], strides = [1, 1]} : vector<16x96xf32> to vector<16x8xf32>
    %23 = vector.extract_strided_slice %9 {offsets = [0, 56], sizes = [16, 8], strides = [1, 1]} : vector<16x96xf32> to vector<16x8xf32>
    %24 = vector.shape_cast %20 : vector<16x8xf32> to vector<1x16x8xf32>
    %25 = vector.shape_cast %21 : vector<16x8xf32> to vector<1x16x8xf32>
    %26 = vector.shape_cast %22 : vector<16x8xf32> to vector<1x16x8xf32>
    %27 = vector.shape_cast %23 : vector<16x8xf32> to vector<1x16x8xf32>
    %28 = tpu.concatenate %24, %25, %26, %27 in 0 : vector<1x16x8xf32>, vector<1x16x8xf32>, vector<1x16x8xf32>, vector<1x16x8xf32> -> vector<4x16x8xf32>
    %29 = arith.truncf %28 : vector<4x16x8xf32> to vector<4x16x8xbf16>
    %30 = vector.extract_strided_slice %9 {offsets = [0, 64], sizes = [16, 8], strides = [1, 1]} : vector<16x96xf32> to vector<16x8xf32>
    %31 = vector.extract_strided_slice %9 {offsets = [0, 72], sizes = [16, 8], strides = [1, 1]} : vector<16x96xf32> to vector<16x8xf32>
    %32 = vector.extract_strided_slice %9 {offsets = [0, 80], sizes = [16, 8], strides = [1, 1]} : vector<16x96xf32> to vector<16x8xf32>
    %33 = vector.extract_strided_slice %9 {offsets = [0, 88], sizes = [16, 8], strides = [1, 1]} : vector<16x96xf32> to vector<16x8xf32>
    %34 = vector.shape_cast %30 : vector<16x8xf32> to vector<1x16x8xf32>
    %35 = vector.shape_cast %31 : vector<16x8xf32> to vector<1x16x8xf32>
    %36 = vector.shape_cast %32 : vector<16x8xf32> to vector<1x16x8xf32>
    %37 = vector.shape_cast %33 : vector<16x8xf32> to vector<1x16x8xf32>
    %38 = tpu.concatenate %34, %35, %36, %37 in 0 : vector<1x16x8xf32>, vector<1x16x8xf32>, vector<1x16x8xf32>, vector<1x16x8xf32> -> vector<4x16x8xf32>
    %39 = arith.truncf %38 : vector<4x16x8xf32> to vector<4x16x8xbf16>
    "tpu.trace_start"() <{level = 10 : i32, message = "hqd,hkd->hqk"}> : () -> ()
    %cst_9 = arith.constant dense<0.000000e+00> : vector<4x16x16xf32>
    %40 = tpu.matmul %19, %29, %cst_9 {dimension_numbers = #tpu.dot_dimension_numbers<[2], [2], [1], [1], [0, 0, 0, 1, 1, 1], [0], [0]>} : vector<4x16x8xbf16>, vector<4x16x8xbf16>, vector<4x16x16xf32> -> vector<4x16x16xf32>
    "tpu.trace_stop"() : () -> ()
    %41 = vector.shape_cast %1 : vector<16x16xf32> to vector<1x16x16xf32>
    %42 = vector.broadcast %41 : vector<1x16x16xf32> to vector<4x16x16xf32>
    %43 = arith.addf %40, %42 : vector<4x16x16xf32>
    %cst_10 = arith.constant dense<0xFF800000> : vector<4x16xf32>
    %44 = vector.multi_reduction <maximumf>, %43, %cst_10 [2] : vector<4x16x16xf32> to vector<4x16xf32>
    %45 = vector.shape_cast %44 : vector<4x16xf32> to vector<4x16x1xf32>
    %46 = vector.broadcast %45 : vector<4x16x1xf32> to vector<4x16x16xf32>
    %47 = arith.subf %43, %46 : vector<4x16x16xf32>
    %48 = math.exp %47 : vector<4x16x16xf32>
    %cst_11 = arith.constant dense<0.000000e+00> : vector<4x16xf32>
    %49 = vector.multi_reduction <add>, %48, %cst_11 [2] : vector<4x16x16xf32> to vector<4x16xf32>
    %50 = vector.shape_cast %49 : vector<4x16xf32> to vector<4x16x1xf32>
    %51 = tpu.reciprocal %50 {approx = true} : vector<4x16x1xf32> -> vector<4x16x1xf32>
    %52 = vector.broadcast %51 : vector<4x16x1xf32> to vector<4x16x16xf32>
    %53 = arith.mulf %48, %52 : vector<4x16x16xf32>
    %54 = arith.truncf %53 : vector<4x16x16xf32> to vector<4x16x16xbf16>
    "tpu.trace_start"() <{level = 10 : i32, message = "hqk,hkd->hqd"}> : () -> ()
    %cst_12 = arith.constant dense<0.000000e+00> : vector<4x16x8xf32>
    %55 = tpu.matmul %54, %39, %cst_12 {dimension_numbers = #tpu.dot_dimension_numbers<[2], [1], [1], [2], [0, 0, 0, 1, 1, 2], [0], [0]>} : vector<4x16x16xbf16>, vector<4x16x8xbf16>, vector<4x16x8xf32> -> vector<4x16x8xf32>
    "tpu.trace_stop"() : () -> ()
    %56 = vector.extract_strided_slice %55 {offsets = [0, 0, 0], sizes = [1, 16, 8], strides = [1, 1, 1]} : vector<4x16x8xf32> to vector<1x16x8xf32>
    %57 = vector.shape_cast %56 : vector<1x16x8xf32> to vector<16x8xf32>
    %58 = vector.extract_strided_slice %55 {offsets = [1, 0, 0], sizes = [1, 16, 8], strides = [1, 1, 1]} : vector<4x16x8xf32> to vector<1x16x8xf32>
    %59 = vector.shape_cast %58 : vector<1x16x8xf32> to vector<16x8xf32>
    %60 = vector.extract_strided_slice %55 {offsets = [2, 0, 0], sizes = [1, 16, 8], strides = [1, 1, 1]} : vector<4x16x8xf32> to vector<1x16x8xf32>
    %61 = vector.shape_cast %60 : vector<1x16x8xf32> to vector<16x8xf32>
    %62 = vector.extract_strided_slice %55 {offsets = [3, 0, 0], sizes = [1, 16, 8], strides = [1, 1, 1]} : vector<4x16x8xf32> to vector<1x16x8xf32>
    %63 = vector.shape_cast %62 : vector<1x16x8xf32> to vector<16x8xf32>
    %64 = tpu.concatenate %57, %59, %61, %63 in 1 : vector<16x8xf32>, vector<16x8xf32>, vector<16x8xf32>, vector<16x8xf32> -> vector<16x32xf32>
    %65 = arith.truncf %64 : vector<16x32xf32> to vector<16x32xbf16>
    %c0_13 = arith.constant 0 : index
    %c0_14 = arith.constant 0 : index
    %c0_15 = arith.constant 0 : index
    %66 = vector.load %arg4[%c0_13, %c0_14, %c0_15] : memref<2x32x32xbf16, #tpu.memory_space<vmem>>, vector<1x32x32xbf16>
    %67 = vector.shape_cast %66 : vector<1x32x32xbf16> to vector<32x32xbf16>
    %cst_16 = arith.constant dense<0.000000e+00> : vector<16x32xf32>
    %68 = tpu.matmul %65, %67, %cst_16 {dimension_numbers = #tpu.dot_dimension_numbers<[1], [0], [0], [1], [0, 0, 1, 1], [], []>} : vector<16x32xbf16>, vector<32x32xbf16>, vector<16x32xf32> -> vector<16x32xf32>
    %c0_17 = arith.constant 0 : index
    %c0_18 = arith.constant 0 : index
    %c0_19 = arith.constant 0 : index
    %69 = vector.load %arg5[%c0_17, %c0_18, %c0_19] : memref<2x1x32xf32, #tpu.memory_space<vmem>>, vector<1x1x32xf32>
    %70 = vector.shape_cast %69 : vector<1x1x32xf32> to vector<1x32xf32>
    %71 = vector.broadcast %70 : vector<1x32xf32> to vector<16x32xf32>
    %72 = arith.addf %68, %71 : vector<16x32xf32>
    %73 = arith.addf %0, %72 : vector<16x32xf32>
    %c0_20 = arith.constant 0 : index
    %c0_21 = arith.constant 0 : index
    %c0_22 = arith.constant 0 : index
    %74 = vector.load %arg10[%c0_20, %c0_21, %c0_22] : memref<2x1x32xf32, #tpu.memory_space<vmem>>, vector<1x1x32xf32>
    %75 = vector.shape_cast %74 : vector<1x1x32xf32> to vector<1x32xf32>
    %c0_23 = arith.constant 0 : index
    %c0_24 = arith.constant 0 : index
    %c0_25 = arith.constant 0 : index
    %76 = vector.load %arg11[%c0_23, %c0_24, %c0_25] : memref<2x1x32xf32, #tpu.memory_space<vmem>>, vector<1x1x32xf32>
    %77 = vector.shape_cast %76 : vector<1x1x32xf32> to vector<1x32xf32>
    %cst_26 = arith.constant dense<0.000000e+00> : vector<16xf32>
    %78 = vector.multi_reduction <add>, %73, %cst_26 [1] : vector<16x32xf32> to vector<16xf32>
    %79 = vector.shape_cast %78 : vector<16xf32> to vector<16x1xf32>
    %cst_27 = arith.constant 3.200000e+01 : f32
    %80 = vector.broadcast %cst_27 : f32 to vector<16x1xf32>
    %81 = arith.divf %79, %80 : vector<16x1xf32>
    %82 = vector.broadcast %81 : vector<16x1xf32> to vector<16x32xf32>
    %83 = arith.subf %73, %82 : vector<16x32xf32>
    %84 = arith.mulf %83, %83 : vector<16x32xf32>
    %cst_28 = arith.constant dense<0.000000e+00> : vector<16xf32>
    %85 = vector.multi_reduction <add>, %84, %cst_28 [1] : vector<16x32xf32> to vector<16xf32>
    %86 = vector.shape_cast %85 : vector<16xf32> to vector<16x1xf32>
    %cst_29 = arith.constant 3.200000e+01 : f32
    %87 = vector.broadcast %cst_29 : f32 to vector<16x1xf32>
    %88 = arith.divf %86, %87 : vector<16x1xf32>
    %89 = vector.broadcast %81 : vector<16x1xf32> to vector<16x32xf32>
    %90 = arith.subf %73, %89 : vector<16x32xf32>
    %cst_30 = arith.constant 9.99999974E-6 : f32
    %91 = vector.broadcast %cst_30 : f32 to vector<16x1xf32>
    %92 = arith.addf %88, %91 : vector<16x1xf32>
    %93 = math.rsqrt %92 : vector<16x1xf32>
    %94 = vector.broadcast %93 : vector<16x1xf32> to vector<16x32xf32>
    %95 = arith.mulf %90, %94 : vector<16x32xf32>
    %96 = vector.broadcast %75 : vector<1x32xf32> to vector<16x32xf32>
    %97 = arith.mulf %95, %96 : vector<16x32xf32>
    %98 = vector.broadcast %77 : vector<1x32xf32> to vector<16x32xf32>
    %99 = arith.addf %97, %98 : vector<16x32xf32>
    %100 = arith.truncf %99 : vector<16x32xf32> to vector<16x32xbf16>
    %c0_31 = arith.constant 0 : index
    %c0_32 = arith.constant 0 : index
    %c0_33 = arith.constant 0 : index
    %101 = vector.load %arg6[%c0_31, %c0_32, %c0_33] : memref<2x32x64xbf16, #tpu.memory_space<vmem>>, vector<1x32x64xbf16>
    %102 = vector.shape_cast %101 : vector<1x32x64xbf16> to vector<32x64xbf16>
    %cst_34 = arith.constant dense<0.000000e+00> : vector<16x64xf32>
    %103 = tpu.matmul %100, %102, %cst_34 {dimension_numbers = #tpu.dot_dimension_numbers<[1], [0], [0], [1], [0, 0, 1, 1], [], []>} : vector<16x32xbf16>, vector<32x64xbf16>, vector<16x64xf32> -> vector<16x64xf32>
    %c0_35 = arith.constant 0 : index
    %c0_36 = arith.constant 0 : index
    %c0_37 = arith.constant 0 : index
    %104 = vector.load %arg7[%c0_35, %c0_36, %c0_37] : memref<2x1x64xf32, #tpu.memory_space<vmem>>, vector<1x1x64xf32>
    %105 = vector.shape_cast %104 : vector<1x1x64xf32> to vector<1x64xf32>
    %106 = vector.broadcast %105 : vector<1x64xf32> to vector<16x64xf32>
    %107 = arith.addf %103, %106 : vector<16x64xf32>
    %cst_38 = arith.constant 0.000000e+00 : f32
    %108 = vector.broadcast %cst_38 : f32 to vector<16x64xf32>
    %109 = arith.maximumf %107, %108 : vector<16x64xf32>
    %110 = arith.truncf %109 : vector<16x64xf32> to vector<16x64xbf16>
    %c0_39 = arith.constant 0 : index
    %c0_40 = arith.constant 0 : index
    %c0_41 = arith.constant 0 : index
    %111 = vector.load %arg8[%c0_39, %c0_40, %c0_41] : memref<2x64x32xbf16, #tpu.memory_space<vmem>>, vector<1x64x32xbf16>
    %112 = vector.shape_cast %111 : vector<1x64x32xbf16> to vector<64x32xbf16>
    %cst_42 = arith.constant dense<0.000000e+00> : vector<16x32xf32>
    %113 = tpu.matmul %110, %112, %cst_42 {dimension_numbers = #tpu.dot_dimension_numbers<[1], [0], [0], [1], [0, 0, 1, 1], [], []>} : vector<16x64xbf16>, vector<64x32xbf16>, vector<16x32xf32> -> vector<16x32xf32>
    %c0_43 = arith.constant 0 : index
    %c0_44 = arith.constant 0 : index
    %c0_45 = arith.constant 0 : index
    %114 = vector.load %arg9[%c0_43, %c0_44, %c0_45] : memref<2x1x32xf32, #tpu.memory_space<vmem>>, vector<1x1x32xf32>
    %115 = vector.shape_cast %114 : vector<1x1x32xf32> to vector<1x32xf32>
    %116 = vector.broadcast %115 : vector<1x32xf32> to vector<16x32xf32>
    %117 = arith.addf %113, %116 : vector<16x32xf32>
    %118 = arith.addf %99, %117 : vector<16x32xf32>
    %c0_46 = arith.constant 0 : index
    %c0_47 = arith.constant 0 : index
    %c0_48 = arith.constant 0 : index
    %119 = vector.load %arg12[%c0_46, %c0_47, %c0_48] : memref<2x1x32xf32, #tpu.memory_space<vmem>>, vector<1x1x32xf32>
    %120 = vector.shape_cast %119 : vector<1x1x32xf32> to vector<1x32xf32>
    %c0_49 = arith.constant 0 : index
    %c0_50 = arith.constant 0 : index
    %c0_51 = arith.constant 0 : index
    %121 = vector.load %arg13[%c0_49, %c0_50, %c0_51] : memref<2x1x32xf32, #tpu.memory_space<vmem>>, vector<1x1x32xf32>
    %122 = vector.shape_cast %121 : vector<1x1x32xf32> to vector<1x32xf32>
    %cst_52 = arith.constant dense<0.000000e+00> : vector<16xf32>
    %123 = vector.multi_reduction <add>, %118, %cst_52 [1] : vector<16x32xf32> to vector<16xf32>
    %124 = vector.shape_cast %123 : vector<16xf32> to vector<16x1xf32>
    %cst_53 = arith.constant 3.200000e+01 : f32
    %125 = vector.broadcast %cst_53 : f32 to vector<16x1xf32>
    %126 = arith.divf %124, %125 : vector<16x1xf32>
    %127 = vector.broadcast %126 : vector<16x1xf32> to vector<16x32xf32>
    %128 = arith.subf %118, %127 : vector<16x32xf32>
    %129 = arith.mulf %128, %128 : vector<16x32xf32>
    %cst_54 = arith.constant dense<0.000000e+00> : vector<16xf32>
    %130 = vector.multi_reduction <add>, %129, %cst_54 [1] : vector<16x32xf32> to vector<16xf32>
    %131 = vector.shape_cast %130 : vector<16xf32> to vector<16x1xf32>
    %cst_55 = arith.constant 3.200000e+01 : f32
    %132 = vector.broadcast %cst_55 : f32 to vector<16x1xf32>
    %133 = arith.divf %131, %132 : vector<16x1xf32>
    %134 = vector.broadcast %126 : vector<16x1xf32> to vector<16x32xf32>
    %135 = arith.subf %118, %134 : vector<16x32xf32>
    %cst_56 = arith.constant 9.99999974E-6 : f32
    %136 = vector.broadcast %cst_56 : f32 to vector<16x1xf32>
    %137 = arith.addf %133, %136 : vector<16x1xf32>
    %138 = math.rsqrt %137 : vector<16x1xf32>
    %139 = vector.broadcast %138 : vector<16x1xf32> to vector<16x32xf32>
    %140 = arith.mulf %135, %139 : vector<16x32xf32>
    %141 = vector.broadcast %120 : vector<1x32xf32> to vector<16x32xf32>
    %142 = arith.mulf %140, %141 : vector<16x32xf32>
    %143 = vector.broadcast %122 : vector<1x32xf32> to vector<16x32xf32>
    %144 = arith.addf %142, %143 : vector<16x32xf32>
    %145 = arith.truncf %144 : vector<16x32xf32> to vector<16x32xbf16>
    %c1 = arith.constant 1 : index
    %c0_57 = arith.constant 0 : index
    %c0_58 = arith.constant 0 : index
    %146 = vector.load %arg2[%c1, %c0_57, %c0_58] : memref<2x32x96xbf16, #tpu.memory_space<vmem>>, vector<1x32x96xbf16>
    %147 = vector.shape_cast %146 : vector<1x32x96xbf16> to vector<32x96xbf16>
    %cst_59 = arith.constant dense<0.000000e+00> : vector<16x96xf32>
    %148 = tpu.matmul %145, %147, %cst_59 {dimension_numbers = #tpu.dot_dimension_numbers<[1], [0], [0], [1], [0, 0, 1, 1], [], []>} : vector<16x32xbf16>, vector<32x96xbf16>, vector<16x96xf32> -> vector<16x96xf32>
    %c1_60 = arith.constant 1 : index
    %c0_61 = arith.constant 0 : index
    %c0_62 = arith.constant 0 : index
    %149 = vector.load %arg3[%c1_60, %c0_61, %c0_62] : memref<2x1x96xf32, #tpu.memory_space<vmem>>, vector<1x1x96xf32>
    %150 = vector.shape_cast %149 : vector<1x1x96xf32> to vector<1x96xf32>
    %151 = vector.broadcast %150 : vector<1x96xf32> to vector<16x96xf32>
    %152 = arith.addf %148, %151 : vector<16x96xf32>
    %153 = vector.extract_strided_slice %152 {offsets = [0, 0], sizes = [16, 8], strides = [1, 1]} : vector<16x96xf32> to vector<16x8xf32>
    %154 = vector.extract_strided_slice %152 {offsets = [0, 8], sizes = [16, 8], strides = [1, 1]} : vector<16x96xf32> to vector<16x8xf32>
    %155 = vector.extract_strided_slice %152 {offsets = [0, 16], sizes = [16, 8], strides = [1, 1]} : vector<16x96xf32> to vector<16x8xf32>
    %156 = vector.extract_strided_slice %152 {offsets = [0, 24], sizes = [16, 8], strides = [1, 1]} : vector<16x96xf32> to vector<16x8xf32>
    %157 = vector.shape_cast %153 : vector<16x8xf32> to vector<1x16x8xf32>
    %158 = vector.shape_cast %154 : vector<16x8xf32> to vector<1x16x8xf32>
    %159 = vector.shape_cast %155 : vector<16x8xf32> to vector<1x16x8xf32>
    %160 = vector.shape_cast %156 : vector<16x8xf32> to vector<1x16x8xf32>
    %161 = tpu.concatenate %157, %158, %159, %160 in 0 : vector<1x16x8xf32>, vector<1x16x8xf32>, vector<1x16x8xf32>, vector<1x16x8xf32> -> vector<4x16x8xf32>
    %162 = arith.truncf %161 : vector<4x16x8xf32> to vector<4x16x8xbf16>
    %163 = vector.extract_strided_slice %152 {offsets = [0, 32], sizes = [16, 8], strides = [1, 1]} : vector<16x96xf32> to vector<16x8xf32>
    %164 = vector.extract_strided_slice %152 {offsets = [0, 40], sizes = [16, 8], strides = [1, 1]} : vector<16x96xf32> to vector<16x8xf32>
    %165 = vector.extract_strided_slice %152 {offsets = [0, 48], sizes = [16, 8], strides = [1, 1]} : vector<16x96xf32> to vector<16x8xf32>
    %166 = vector.extract_strided_slice %152 {offsets = [0, 56], sizes = [16, 8], strides = [1, 1]} : vector<16x96xf32> to vector<16x8xf32>
    %167 = vector.shape_cast %163 : vector<16x8xf32> to vector<1x16x8xf32>
    %168 = vector.shape_cast %164 : vector<16x8xf32> to vector<1x16x8xf32>
    %169 = vector.shape_cast %165 : vector<16x8xf32> to vector<1x16x8xf32>
    %170 = vector.shape_cast %166 : vector<16x8xf32> to vector<1x16x8xf32>
    %171 = tpu.concatenate %167, %168, %169, %170 in 0 : vector<1x16x8xf32>, vector<1x16x8xf32>, vector<1x16x8xf32>, vector<1x16x8xf32> -> vector<4x16x8xf32>
    %172 = arith.truncf %171 : vector<4x16x8xf32> to vector<4x16x8xbf16>
    %173 = vector.extract_strided_slice %152 {offsets = [0, 64], sizes = [16, 8], strides = [1, 1]} : vector<16x96xf32> to vector<16x8xf32>
    %174 = vector.extract_strided_slice %152 {offsets = [0, 72], sizes = [16, 8], strides = [1, 1]} : vector<16x96xf32> to vector<16x8xf32>
    %175 = vector.extract_strided_slice %152 {offsets = [0, 80], sizes = [16, 8], strides = [1, 1]} : vector<16x96xf32> to vector<16x8xf32>
    %176 = vector.extract_strided_slice %152 {offsets = [0, 88], sizes = [16, 8], strides = [1, 1]} : vector<16x96xf32> to vector<16x8xf32>
    %177 = vector.shape_cast %173 : vector<16x8xf32> to vector<1x16x8xf32>
    %178 = vector.shape_cast %174 : vector<16x8xf32> to vector<1x16x8xf32>
    %179 = vector.shape_cast %175 : vector<16x8xf32> to vector<1x16x8xf32>
    %180 = vector.shape_cast %176 : vector<16x8xf32> to vector<1x16x8xf32>
    %181 = tpu.concatenate %177, %178, %179, %180 in 0 : vector<1x16x8xf32>, vector<1x16x8xf32>, vector<1x16x8xf32>, vector<1x16x8xf32> -> vector<4x16x8xf32>
    %182 = arith.truncf %181 : vector<4x16x8xf32> to vector<4x16x8xbf16>
    "tpu.trace_start"() <{level = 10 : i32, message = "hqd,hkd->hqk"}> : () -> ()
    %cst_63 = arith.constant dense<0.000000e+00> : vector<4x16x16xf32>
    %183 = tpu.matmul %162, %172, %cst_63 {dimension_numbers = #tpu.dot_dimension_numbers<[2], [2], [1], [1], [0, 0, 0, 1, 1, 1], [0], [0]>} : vector<4x16x8xbf16>, vector<4x16x8xbf16>, vector<4x16x16xf32> -> vector<4x16x16xf32>
    "tpu.trace_stop"() : () -> ()
    %184 = vector.shape_cast %1 : vector<16x16xf32> to vector<1x16x16xf32>
    %185 = vector.broadcast %184 : vector<1x16x16xf32> to vector<4x16x16xf32>
    %186 = arith.addf %183, %185 : vector<4x16x16xf32>
    %cst_64 = arith.constant dense<0xFF800000> : vector<4x16xf32>
    %187 = vector.multi_reduction <maximumf>, %186, %cst_64 [2] : vector<4x16x16xf32> to vector<4x16xf32>
    %188 = vector.shape_cast %187 : vector<4x16xf32> to vector<4x16x1xf32>
    %189 = vector.broadcast %188 : vector<4x16x1xf32> to vector<4x16x16xf32>
    %190 = arith.subf %186, %189 : vector<4x16x16xf32>
    %191 = math.exp %190 : vector<4x16x16xf32>
    %cst_65 = arith.constant dense<0.000000e+00> : vector<4x16xf32>
    %192 = vector.multi_reduction <add>, %191, %cst_65 [2] : vector<4x16x16xf32> to vector<4x16xf32>
    %193 = vector.shape_cast %192 : vector<4x16xf32> to vector<4x16x1xf32>
    %194 = tpu.reciprocal %193 {approx = true} : vector<4x16x1xf32> -> vector<4x16x1xf32>
    %195 = vector.broadcast %194 : vector<4x16x1xf32> to vector<4x16x16xf32>
    %196 = arith.mulf %191, %195 : vector<4x16x16xf32>
    %197 = arith.truncf %196 : vector<4x16x16xf32> to vector<4x16x16xbf16>
    "tpu.trace_start"() <{level = 10 : i32, message = "hqk,hkd->hqd"}> : () -> ()
    %cst_66 = arith.constant dense<0.000000e+00> : vector<4x16x8xf32>
    %198 = tpu.matmul %197, %182, %cst_66 {dimension_numbers = #tpu.dot_dimension_numbers<[2], [1], [1], [2], [0, 0, 0, 1, 1, 2], [0], [0]>} : vector<4x16x16xbf16>, vector<4x16x8xbf16>, vector<4x16x8xf32> -> vector<4x16x8xf32>
    "tpu.trace_stop"() : () -> ()
    %199 = vector.extract_strided_slice %198 {offsets = [0, 0, 0], sizes = [1, 16, 8], strides = [1, 1, 1]} : vector<4x16x8xf32> to vector<1x16x8xf32>
    %200 = vector.shape_cast %199 : vector<1x16x8xf32> to vector<16x8xf32>
    %201 = vector.extract_strided_slice %198 {offsets = [1, 0, 0], sizes = [1, 16, 8], strides = [1, 1, 1]} : vector<4x16x8xf32> to vector<1x16x8xf32>
    %202 = vector.shape_cast %201 : vector<1x16x8xf32> to vector<16x8xf32>
    %203 = vector.extract_strided_slice %198 {offsets = [2, 0, 0], sizes = [1, 16, 8], strides = [1, 1, 1]} : vector<4x16x8xf32> to vector<1x16x8xf32>
    %204 = vector.shape_cast %203 : vector<1x16x8xf32> to vector<16x8xf32>
    %205 = vector.extract_strided_slice %198 {offsets = [3, 0, 0], sizes = [1, 16, 8], strides = [1, 1, 1]} : vector<4x16x8xf32> to vector<1x16x8xf32>
    %206 = vector.shape_cast %205 : vector<1x16x8xf32> to vector<16x8xf32>
    %207 = tpu.concatenate %200, %202, %204, %206 in 1 : vector<16x8xf32>, vector<16x8xf32>, vector<16x8xf32>, vector<16x8xf32> -> vector<16x32xf32>
    %208 = arith.truncf %207 : vector<16x32xf32> to vector<16x32xbf16>
    %c1_67 = arith.constant 1 : index
    %c0_68 = arith.constant 0 : index
    %c0_69 = arith.constant 0 : index
    %209 = vector.load %arg4[%c1_67, %c0_68, %c0_69] : memref<2x32x32xbf16, #tpu.memory_space<vmem>>, vector<1x32x32xbf16>
    %210 = vector.shape_cast %209 : vector<1x32x32xbf16> to vector<32x32xbf16>
    %cst_70 = arith.constant dense<0.000000e+00> : vector<16x32xf32>
    %211 = tpu.matmul %208, %210, %cst_70 {dimension_numbers = #tpu.dot_dimension_numbers<[1], [0], [0], [1], [0, 0, 1, 1], [], []>} : vector<16x32xbf16>, vector<32x32xbf16>, vector<16x32xf32> -> vector<16x32xf32>
    %c1_71 = arith.constant 1 : index
    %c0_72 = arith.constant 0 : index
    %c0_73 = arith.constant 0 : index
    %212 = vector.load %arg5[%c1_71, %c0_72, %c0_73] : memref<2x1x32xf32, #tpu.memory_space<vmem>>, vector<1x1x32xf32>
    %213 = vector.shape_cast %212 : vector<1x1x32xf32> to vector<1x32xf32>
    %214 = vector.broadcast %213 : vector<1x32xf32> to vector<16x32xf32>
    %215 = arith.addf %211, %214 : vector<16x32xf32>
    %216 = arith.addf %144, %215 : vector<16x32xf32>
    %c1_74 = arith.constant 1 : index
    %c0_75 = arith.constant 0 : index
    %c0_76 = arith.constant 0 : index
    %217 = vector.load %arg10[%c1_74, %c0_75, %c0_76] : memref<2x1x32xf32, #tpu.memory_space<vmem>>, vector<1x1x32xf32>
    %218 = vector.shape_cast %217 : vector<1x1x32xf32> to vector<1x32xf32>
    %c1_77 = arith.constant 1 : index
    %c0_78 = arith.constant 0 : index
    %c0_79 = arith.constant 0 : index
    %219 = vector.load %arg11[%c1_77, %c0_78, %c0_79] : memref<2x1x32xf32, #tpu.memory_space<vmem>>, vector<1x1x32xf32>
    %220 = vector.shape_cast %219 : vector<1x1x32xf32> to vector<1x32xf32>
    %cst_80 = arith.constant dense<0.000000e+00> : vector<16xf32>
    %221 = vector.multi_reduction <add>, %216, %cst_80 [1] : vector<16x32xf32> to vector<16xf32>
    %222 = vector.shape_cast %221 : vector<16xf32> to vector<16x1xf32>
    %cst_81 = arith.constant 3.200000e+01 : f32
    %223 = vector.broadcast %cst_81 : f32 to vector<16x1xf32>
    %224 = arith.divf %222, %223 : vector<16x1xf32>
    %225 = vector.broadcast %224 : vector<16x1xf32> to vector<16x32xf32>
    %226 = arith.subf %216, %225 : vector<16x32xf32>
    %227 = arith.mulf %226, %226 : vector<16x32xf32>
    %cst_82 = arith.constant dense<0.000000e+00> : vector<16xf32>
    %228 = vector.multi_reduction <add>, %227, %cst_82 [1] : vector<16x32xf32> to vector<16xf32>
    %229 = vector.shape_cast %228 : vector<16xf32> to vector<16x1xf32>
    %cst_83 = arith.constant 3.200000e+01 : f32
    %230 = vector.broadcast %cst_83 : f32 to vector<16x1xf32>
    %231 = arith.divf %229, %230 : vector<16x1xf32>
    %232 = vector.broadcast %224 : vector<16x1xf32> to vector<16x32xf32>
    %233 = arith.subf %216, %232 : vector<16x32xf32>
    %cst_84 = arith.constant 9.99999974E-6 : f32
    %234 = vector.broadcast %cst_84 : f32 to vector<16x1xf32>
    %235 = arith.addf %231, %234 : vector<16x1xf32>
    %236 = math.rsqrt %235 : vector<16x1xf32>
    %237 = vector.broadcast %236 : vector<16x1xf32> to vector<16x32xf32>
    %238 = arith.mulf %233, %237 : vector<16x32xf32>
    %239 = vector.broadcast %218 : vector<1x32xf32> to vector<16x32xf32>
    %240 = arith.mulf %238, %239 : vector<16x32xf32>
    %241 = vector.broadcast %220 : vector<1x32xf32> to vector<16x32xf32>
    %242 = arith.addf %240, %241 : vector<16x32xf32>
    %243 = arith.truncf %242 : vector<16x32xf32> to vector<16x32xbf16>
    %c1_85 = arith.constant 1 : index
    %c0_86 = arith.constant 0 : index
    %c0_87 = arith.constant 0 : index
    %244 = vector.load %arg6[%c1_85, %c0_86, %c0_87] : memref<2x32x64xbf16, #tpu.memory_space<vmem>>, vector<1x32x64xbf16>
    %245 = vector.shape_cast %244 : vector<1x32x64xbf16> to vector<32x64xbf16>
    %cst_88 = arith.constant dense<0.000000e+00> : vector<16x64xf32>
    %246 = tpu.matmul %243, %245, %cst_88 {dimension_numbers = #tpu.dot_dimension_numbers<[1], [0], [0], [1], [0, 0, 1, 1], [], []>} : vector<16x32xbf16>, vector<32x64xbf16>, vector<16x64xf32> -> vector<16x64xf32>
    %c1_89 = arith.constant 1 : index
    %c0_90 = arith.constant 0 : index
    %c0_91 = arith.constant 0 : index
    %247 = vector.load %arg7[%c1_89, %c0_90, %c0_91] : memref<2x1x64xf32, #tpu.memory_space<vmem>>, vector<1x1x64xf32>
    %248 = vector.shape_cast %247 : vector<1x1x64xf32> to vector<1x64xf32>
    %249 = vector.broadcast %248 : vector<1x64xf32> to vector<16x64xf32>
    %250 = arith.addf %246, %249 : vector<16x64xf32>
    %cst_92 = arith.constant 0.000000e+00 : f32
    %251 = vector.broadcast %cst_92 : f32 to vector<16x64xf32>
    %252 = arith.maximumf %250, %251 : vector<16x64xf32>
    %253 = arith.truncf %252 : vector<16x64xf32> to vector<16x64xbf16>
    %c1_93 = arith.constant 1 : index
    %c0_94 = arith.constant 0 : index
    %c0_95 = arith.constant 0 : index
    %254 = vector.load %arg8[%c1_93, %c0_94, %c0_95] : memref<2x64x32xbf16, #tpu.memory_space<vmem>>, vector<1x64x32xbf16>
    %255 = vector.shape_cast %254 : vector<1x64x32xbf16> to vector<64x32xbf16>
    %cst_96 = arith.constant dense<0.000000e+00> : vector<16x32xf32>
    %256 = tpu.matmul %253, %255, %cst_96 {dimension_numbers = #tpu.dot_dimension_numbers<[1], [0], [0], [1], [0, 0, 1, 1], [], []>} : vector<16x64xbf16>, vector<64x32xbf16>, vector<16x32xf32> -> vector<16x32xf32>
    %c1_97 = arith.constant 1 : index
    %c0_98 = arith.constant 0 : index
    %c0_99 = arith.constant 0 : index
    %257 = vector.load %arg9[%c1_97, %c0_98, %c0_99] : memref<2x1x32xf32, #tpu.memory_space<vmem>>, vector<1x1x32xf32>
    %258 = vector.shape_cast %257 : vector<1x1x32xf32> to vector<1x32xf32>
    %259 = vector.broadcast %258 : vector<1x32xf32> to vector<16x32xf32>
    %260 = arith.addf %256, %259 : vector<16x32xf32>
    %261 = arith.addf %242, %260 : vector<16x32xf32>
    %c1_100 = arith.constant 1 : index
    %c0_101 = arith.constant 0 : index
    %c0_102 = arith.constant 0 : index
    %262 = vector.load %arg12[%c1_100, %c0_101, %c0_102] : memref<2x1x32xf32, #tpu.memory_space<vmem>>, vector<1x1x32xf32>
    %263 = vector.shape_cast %262 : vector<1x1x32xf32> to vector<1x32xf32>
    %c1_103 = arith.constant 1 : index
    %c0_104 = arith.constant 0 : index
    %c0_105 = arith.constant 0 : index
    %264 = vector.load %arg13[%c1_103, %c0_104, %c0_105] : memref<2x1x32xf32, #tpu.memory_space<vmem>>, vector<1x1x32xf32>
    %265 = vector.shape_cast %264 : vector<1x1x32xf32> to vector<1x32xf32>
    %cst_106 = arith.constant dense<0.000000e+00> : vector<16xf32>
    %266 = vector.multi_reduction <add>, %261, %cst_106 [1] : vector<16x32xf32> to vector<16xf32>
    %267 = vector.shape_cast %266 : vector<16xf32> to vector<16x1xf32>
    %cst_107 = arith.constant 3.200000e+01 : f32
    %268 = vector.broadcast %cst_107 : f32 to vector<16x1xf32>
    %269 = arith.divf %267, %268 : vector<16x1xf32>
    %270 = vector.broadcast %269 : vector<16x1xf32> to vector<16x32xf32>
    %271 = arith.subf %261, %270 : vector<16x32xf32>
    %272 = arith.mulf %271, %271 : vector<16x32xf32>
    %cst_108 = arith.constant dense<0.000000e+00> : vector<16xf32>
    %273 = vector.multi_reduction <add>, %272, %cst_108 [1] : vector<16x32xf32> to vector<16xf32>
    %274 = vector.shape_cast %273 : vector<16xf32> to vector<16x1xf32>
    %cst_109 = arith.constant 3.200000e+01 : f32
    %275 = vector.broadcast %cst_109 : f32 to vector<16x1xf32>
    %276 = arith.divf %274, %275 : vector<16x1xf32>
    %277 = vector.broadcast %269 : vector<16x1xf32> to vector<16x32xf32>
    %278 = arith.subf %261, %277 : vector<16x32xf32>
    %cst_110 = arith.constant 9.99999974E-6 : f32
    %279 = vector.broadcast %cst_110 : f32 to vector<16x1xf32>
    %280 = arith.addf %276, %279 : vector<16x1xf32>
    %281 = math.rsqrt %280 : vector<16x1xf32>
    %282 = vector.broadcast %281 : vector<16x1xf32> to vector<16x32xf32>
    %283 = arith.mulf %278, %282 : vector<16x32xf32>
    %284 = vector.broadcast %263 : vector<1x32xf32> to vector<16x32xf32>
    %285 = arith.mulf %283, %284 : vector<16x32xf32>
    %286 = vector.broadcast %265 : vector<1x32xf32> to vector<16x32xf32>
    %287 = arith.addf %285, %286 : vector<16x32xf32>
    %c0_111 = arith.constant 0 : index
    %c0_112 = arith.constant 0 : index
    %288 = vector.load %arg14[%c0_111, %c0_112] : memref<1x32xf32, #tpu.memory_space<vmem>>, vector<1x32xf32>
    %c0_113 = arith.constant 0 : index
    %c0_114 = arith.constant 0 : index
    %289 = vector.load %arg15[%c0_113, %c0_114] : memref<1x32xf32, #tpu.memory_space<vmem>>, vector<1x32xf32>
    %cst_115 = arith.constant dense<0.000000e+00> : vector<16xf32>
    %290 = vector.multi_reduction <add>, %287, %cst_115 [1] : vector<16x32xf32> to vector<16xf32>
    %291 = vector.shape_cast %290 : vector<16xf32> to vector<16x1xf32>
    %cst_116 = arith.constant 3.200000e+01 : f32
    %292 = vector.broadcast %cst_116 : f32 to vector<16x1xf32>
    %293 = arith.divf %291, %292 : vector<16x1xf32>
    %294 = vector.broadcast %293 : vector<16x1xf32> to vector<16x32xf32>
    %295 = arith.subf %287, %294 : vector<16x32xf32>
    %296 = arith.mulf %295, %295 : vector<16x32xf32>
    %cst_117 = arith.constant dense<0.000000e+00> : vector<16xf32>
    %297 = vector.multi_reduction <add>, %296, %cst_117 [1] : vector<16x32xf32> to vector<16xf32>
    %298 = vector.shape_cast %297 : vector<16xf32> to vector<16x1xf32>
    %cst_118 = arith.constant 3.200000e+01 : f32
    %299 = vector.broadcast %cst_118 : f32 to vector<16x1xf32>
    %300 = arith.divf %298, %299 : vector<16x1xf32>
    %301 = vector.broadcast %293 : vector<16x1xf32> to vector<16x32xf32>
    %302 = arith.subf %287, %301 : vector<16x32xf32>
    %cst_119 = arith.constant 9.99999974E-6 : f32
    %303 = vector.broadcast %cst_119 : f32 to vector<16x1xf32>
    %304 = arith.addf %300, %303 : vector<16x1xf32>
    %305 = math.rsqrt %304 : vector<16x1xf32>
    %306 = vector.broadcast %305 : vector<16x1xf32> to vector<16x32xf32>
    %307 = arith.mulf %302, %306 : vector<16x32xf32>
    %308 = vector.broadcast %288 : vector<1x32xf32> to vector<16x32xf32>
    %309 = arith.mulf %307, %308 : vector<16x32xf32>
    %310 = vector.broadcast %289 : vector<1x32xf32> to vector<16x32xf32>
    %311 = arith.addf %309, %310 : vector<16x32xf32>
    %312 = vector.extract_strided_slice %311 {offsets = [0, 0], sizes = [4, 32], strides = [1, 1]} : vector<16x32xf32> to vector<4x32xf32>
    %313 = vector.extract_strided_slice %311 {offsets = [4, 0], sizes = [4, 32], strides = [1, 1]} : vector<16x32xf32> to vector<4x32xf32>
    %314 = vector.extract_strided_slice %311 {offsets = [8, 0], sizes = [4, 32], strides = [1, 1]} : vector<16x32xf32> to vector<4x32xf32>
    %315 = vector.extract_strided_slice %311 {offsets = [12, 0], sizes = [4, 32], strides = [1, 1]} : vector<16x32xf32> to vector<4x32xf32>
    %316 = tpu.concatenate %312, %313, %314, %315 in 1 : vector<4x32xf32>, vector<4x32xf32>, vector<4x32xf32>, vector<4x32xf32> -> vector<4x128xf32>
    %c0_120 = arith.constant 0 : index
    %c0_121 = arith.constant 0 : index
    %317 = vector.load %arg16[%c0_120, %c0_121] : memref<4x128xf32, #tpu.memory_space<vmem>>, vector<4x128xf32>
    tpu.vector_store %arg16[%c0_120, %c0_121], %316 {strides = array<i32>} : memref<4x128xf32, #tpu.memory_space<vmem>>, vector<4x128xf32>,
    return
  }
}

</mosaic_0001>

<bundles_post_ra>
// kernel: transformer_encoder.1
= control target key start
LH: loop header
LB: loop body
LE: loop exit
PB: predicated region body
PF: predicated region fallthrough
CT: control target
= control target key end

     0   :  { %s3309_s0 = inlined_call_operand.hbm [shape: f32[16,32], index: 0, kind: input, shape index: {}]   ;;  %s3310_s1 = inlined_call_operand.vmem [shape: f32[16,16], index: 1, kind: input, shape index: {}]   ;;  %s3311_s2 = inlined_call_operand.vmem [shape: bf16[2,32,96], index: 2, kind: input, shape index: {}]   ;;  %s3312_s3 = inlined_call_operand.hbm [shape: f32[2,1,96], index: 3, kind: input, shape index: {}]   ;;  %s3313_s4 = inlined_call_operand.vmem [shape: bf16[2,32,32], index: 4, kind: input, shape index: {}]   ;;  %s3314_s5 = inlined_call_operand.hbm [shape: f32[2,1,32], index: 5, kind: input, shape index: {}]   ;;  %s3315_s6 = inlined_call_operand.vmem [shape: bf16[2,32,64], index: 6, kind: input, shape index: {}]   ;;  %s3316_s7 = inlined_call_operand.hbm [shape: f32[2,1,64], index: 7, kind: input, shape index: {}]   ;;  %s3317_s8 = inlined_call_operand.vmem [shape: bf16[2,64,32], index: 8, kind: input, shape index: {}]   ;;  %s3318_s9 = inlined_call_operand.hbm [shape: f32[2,1,32], index: 9, kind: input, shape index: {}]   ;;  %s3319_s10 = inlined_call_operand.hbm [shape: f32[2,1,32], index: 10, kind: input, shape index: {}]   ;;  %s3320_s11 = inlined_call_operand.hbm [shape: f32[2,1,32], index: 11, kind: input, shape index: {}]   ;;  %s3321_s12 = inlined_call_operand.hbm [shape: f32[2,1,32], index: 12, kind: input, shape index: {}]   ;;  %s3322_s13 = inlined_call_operand.hbm [shape: f32[2,1,32], index: 13, kind: input, shape index: {}]   ;;  %s3323_s14 = inlined_call_operand.vmem [shape: f32[1,32], index: 14, kind: input, shape index: {}]   ;;  %s3324_s15 = inlined_call_operand.vmem [shape: f32[1,32], index: 15, kind: input, shape index: {}]   ;;  %s3325_s16 = inlined_call_operand.vmem [shape: f32[4,128], index: 16, kind: output, shape index: {}]  }
   0x1   :  { %3326 = sst [smem:[#allocation21_spill]] %s3309_s0 }
   0x2   :  { %21 = vsyncpa [#allocation3], 0 }
   0x3   :  { %22 = vsyncpa [#allocation5], 0 }
   0x4   :  { %23 = vsyncpa [#allocation8], 0 }
   0x5   :  { %24 = vsyncpa [#allocation11], 0 }
   0x6   :  { %25 = vsyncpa [#allocation14], 0  ;;  %s2787_s21 = smov [#allocation4]  }
   0x7   :  { %s47_s22 = sshll.u32 %s2787_s21, 4  ;;  %s48_s22 = int_to_ptr.vmem [resolvable:$true] %s47_s22 }
   0x8   :  { %s2605_s23 = scalar_lea.vmem %s48_s22, 32  ;;  %p2610_p1 = scmp.lt.s32.totalorder %s48_s22, %s48_s22 }
   0x9   :  { %p2606_p0 = scmp.ne.s32.totalorder %s48_s22, %s2605_s23  ;;  %p2611_p2 = scmp.lt.s32.totalorder %s2605_s23, %s2605_s23 }
   0xb   :  { %p2612_p3 = por %p2611_p2, %p2610_p1 }
   0xd   :  { %p2613_p4 = pnand %p2612_p3, %p2606_p0 }
   0xf   :  { %2616 = shalt.err (!%p2613_p4)
}
  0x10   :  { %s2788_s24 = smov 16   ;;  %s2789_s25 = smov 1  }
  0x11   :  { %53 = dma.hbm_to_vmem [thread:$0]  %s3312_s3, 32, %s48_s22, [#allocation5], %s2788_s24, %s2788_s24, %s2789_s25  }
  0x12   :  { %s2790_s28 = smov [#allocation7]   ;;  %s2791_s30 = smov [#allocation10]  }
  0x13   :  { %s75_s29 = sshll.u32 %s2790_s28, 4  ;;  %s101_s0 = sshll.u32 %s2791_s30, 4  ;;  %s76_s29 = int_to_ptr.vmem [resolvable:$true] %s75_s29  ;;  %s102_s0 = int_to_ptr.vmem [resolvable:$true] %s101_s0 }
  0x14   :  { %s2625_s17 = scalar_lea.vmem %s76_s29, 32  ;;  %p2630_p6 = scmp.lt.s32.totalorder %s76_s29, %s76_s29 }
  0x15   :  { %p2626_p5 = scmp.ne.s32.totalorder %s76_s29, %s2625_s17  ;;  %p2631_p7 = scmp.lt.s32.totalorder %s2625_s17, %s2625_s17 }
  0x17   :  { %p2632_p8 = por %p2631_p7, %p2630_p6 }
  0x19   :  { %p2633_p9 = pnand %p2632_p8, %p2626_p5 }
  0x1b   :  { %2636 = shalt.err (!%p2633_p9)
}
  0x1c   :  { %81 = dma.hbm_to_vmem [thread:$0]  %s3316_s7, 32, %s76_s29, [#allocation8], %s2788_s24, %s2788_s24, %s2789_s25  }
  0x1d   :  { %s2645_s3 = scalar_lea.vmem %s102_s0, 32  ;;  %p2650_p11 = scmp.lt.s32.totalorder %s102_s0, %s102_s0 }
  0x1e   :  { %p2646_p10 = scmp.ne.s32.totalorder %s102_s0, %s2645_s3  ;;  %p2651_p12 = scmp.lt.s32.totalorder %s2645_s3, %s2645_s3 }
  0x20   :  { %p2652_p13 = por %p2651_p12, %p2650_p11 }
  0x22   :  { %p2653_p0 = pnand %p2652_p13, %p2646_p10 }
  0x24   :  { %2656 = shalt.err (!%p2653_p0)
}
  0x25   :  { %107 = dma.hbm_to_vmem [thread:$0]  %s3319_s10, 32, %s102_s0, [#allocation11], %s2788_s24, %s2788_s24, %s2789_s25  }
  0x26   :  { %s2792_s22 = smov [#allocation13]   ;;  %s2793_s26 = smov [#allocation2]  }
  0x27   :  { %s125_s23 = sshll.u32 %s2792_s22, 4  ;;  %s31_s7 = sshll.u32 %s2793_s26, 4  ;;  %s126_s23 = int_to_ptr.vmem [resolvable:$true] %s125_s23  ;;  %s32_s7 = int_to_ptr.vmem [resolvable:$true] %s31_s7 }
  0x28   :  { %s2665_s27 = scalar_lea.vmem %s126_s23, 32  ;;  %p2670_p2 = scmp.lt.s32.totalorder %s126_s23, %s126_s23 }
  0x29   :  { %p2666_p1 = scmp.ne.s32.totalorder %s126_s23, %s2665_s27  ;;  %p2671_p3 = scmp.lt.s32.totalorder %s2665_s27, %s2665_s27 }
  0x2b   :  { %p2672_p4 = por %p2671_p3, %p2670_p2 }
  0x2d   :  { %p2673_p5 = pnand %p2672_p4, %p2666_p1 }
  0x2f   :  { %2676 = shalt.err (!%p2673_p5)
}
  0x30   :  { %131 = dma.hbm_to_vmem [thread:$0]  %s3321_s12, 32, %s126_s23, [#allocation14], %s2788_s24, %s2788_s24, %s2789_s25  }
  0x31   :  { %s2685_s10 = scalar_lea.vmem %s32_s7, 256  ;;  %p2690_p7 = scmp.lt.s32.totalorder %s32_s7, %s32_s7 }
  0x32   :  { %p2686_p6 = scmp.ne.s32.totalorder %s32_s7, %s2685_s10  ;;  %p2691_p8 = scmp.lt.s32.totalorder %s2685_s10, %s2685_s10 }
  0x34   :  { %p2692_p9 = por %p2691_p8, %p2690_p7 }
  0x36   :  { %p2693_p10 = pnand %p2692_p9, %p2686_p6 }
  0x38   :  { %2696 = shalt.err (!%p2693_p10)
}
  0x39   :  { %s2794_s30 = smov 128   ;;  %s2795_s0 = smov 8  }
  0x3a   :  { %s3327_s19 = sld [smem:[#allocation21_spill]]  ;;  %s2796_s3 = smov [#allocation6]  }
  0x3b   :  { %s61_s20 = sshll.u32 %s2796_s3, 4  ;;  %s2797_s21 = smov [#allocation9]   ;;  %s62_s20 = int_to_ptr.vmem [resolvable:$true] %s61_s20 }
  0x3c   :  { %s89_s12 = sshll.u32 %s2797_s21, 4  ;;  %s2705_s22 = scalar_lea.vmem %s62_s20, 32  ;;  %s90_s12 = int_to_ptr.vmem [resolvable:$true] %s89_s12 }
  0x3d   :  { %p2706_p11 = scmp.ne.s32.totalorder %s62_s20, %s2705_s22  ;;  %p2710_p12 = scmp.lt.s32.totalorder %s62_s20, %s62_s20 }
  0x3e   :  { %p2711_p13 = scmp.lt.s32.totalorder %s2705_s22, %s2705_s22 }
  0x40   :  { %37 = dma.hbm_to_vmem [thread:$0]  %s3327_s19, 256, %s32_s7, [#allocation3], %s2794_s30, %s2794_s30, %s2795_s0  }
  0x41   :  { %p2712_p0 = por %p2711_p13, %p2710_p12 }
  0x43   :  { %p2713_p1 = pnand %p2712_p0, %p2706_p11 }
  0x45   :  { %2716 = shalt.err (!%p2713_p1)
}
  0x46   :  { %67 = dma.hbm_to_vmem [thread:$0]  %s3314_s5, 32, %s62_s20, [#allocation5], %s2788_s24, %s2788_s24, %s2789_s25  }
  0x47   :  { %s2725_s7 = scalar_lea.vmem %s90_s12, 32  ;;  %p2730_p3 = scmp.lt.s32.totalorder %s90_s12, %s90_s12 }
  0x48   :  { %p2726_p2 = scmp.ne.s32.totalorder %s90_s12, %s2725_s7  ;;  %p2731_p4 = scmp.lt.s32.totalorder %s2725_s7, %s2725_s7 }
  0x4a   :  { %p2732_p5 = por %p2731_p4, %p2730_p3 }
  0x4c   :  { %p2733_p6 = pnand %p2732_p5, %p2726_p2 }
  0x4e   :  { %2736 = shalt.err (!%p2733_p6)
}
  0x4f   :  { %95 = dma.hbm_to_vmem [thread:$0]  %s3318_s9, 32, %s90_s12, [#allocation8], %s2788_s24, %s2788_s24, %s2789_s25  }
  0x50   :  { %s2798_s29 = smov [#allocation12]   ;;  %s2799_s30 = smov [#allocation15]  }
  0x51   :  { %s113_s10 = sshll.u32 %s2798_s29, 4  ;;  %s137_s5 = sshll.u32 %s2799_s30, 4  ;;  %s114_s10 = int_to_ptr.vmem [resolvable:$true] %s113_s10  ;;  %s138_s5 = int_to_ptr.vmem [resolvable:$true] %s137_s5 }
  0x52   :  { %s2745_s17 = scalar_lea.vmem %s114_s10, 32  ;;  %p2750_p8 = scmp.lt.s32.totalorder %s114_s10, %s114_s10 }
  0x53   :  { %p2746_p7 = scmp.ne.s32.totalorder %s114_s10, %s2745_s17  ;;  %p2751_p9 = scmp.lt.s32.totalorder %s2745_s17, %s2745_s17 }
  0x55   :  { %p2752_p10 = por %p2751_p9, %p2750_p8 }
  0x57   :  { %p2753_p11 = pnand %p2752_p10, %p2746_p7 }
  0x59   :  { %2756 = shalt.err (!%p2753_p11)
}
  0x5a   :  { %119 = dma.hbm_to_vmem [thread:$0]  %s3320_s11, 32, %s114_s10, [#allocation11], %s2788_s24, %s2788_s24, %s2789_s25  }
  0x5b   :  { %s2765_s9 = scalar_lea.vmem %s138_s5, 32  ;;  %p2770_p13 = scmp.lt.s32.totalorder %s138_s5, %s138_s5 }
  0x5c   :  { %p2766_p12 = scmp.ne.s32.totalorder %s138_s5, %s2765_s9  ;;  %p2771_p0 = scmp.lt.s32.totalorder %s2765_s9, %s2765_s9 }
  0x5e   :  { %p2772_p1 = por %p2771_p0, %p2770_p13 }
  0x60   :  { %p2773_p2 = pnand %p2772_p1, %p2766_p12 }
  0x62   :  { %2776 = shalt.err (!%p2773_p2)
}
  0x63   :  { %143 = dma.hbm_to_vmem [thread:$0]  %s3322_s13, 32, %s138_s5, [#allocation14], %s2788_s24, %s2788_s24, %s2789_s25  }
  0x64   :  { %2777 = dma.done.wait [#allocation3], 256  }
  0x65   :  { %2778 = vsyncadd [#allocation3], 4294967040 }
  0x66   :  { %2779 = dma.done.wait [#allocation5], 64  }
  0x67   :  { %2780 = vsyncadd [#allocation5], 4294967232 }
  0x68   :  { %2781 = dma.done.wait [#allocation8], 64  }
  0x69   :  { %2782 = vsyncadd [#allocation8], 4294967232 }
  0x6a   :  { %2783 = dma.done.wait [#allocation11], 64  }
  0x6b   :  { %2784 = vsyncadd [#allocation11], 4294967232 }
  0x6c   :  { %2785 = dma.done.wait [#allocation14], 64  }
  0x6d   :  { %2786 = vsyncadd [#allocation14], 4294967232  ;;  %v2800_v0 = vmov 0.0   ;;  %vm2801_vm0 = vmmov 0   ;;  %v2493_v1 = vld [vmem:[%s3311_s2 + $0x8] sm:$0xff]   ;;  %v2494_v2 = vld [vmem:[%s3311_s2] sm:$0xff]  }
  0x6e   :  { %2243 = vmatprep.subr.bf16.mxu1 %v2800_v0  ;;  %2247 = vmatprep.mubr.msk.bf16.mxu1 %vm2801_vm0, %v2800_v0  ;;  %v2958_v3 = vld [vmem:[#allocation2] sm:$0xff]  ;;  %v2960_v4 = vld [vmem:[#allocation2 + $0x8] sm:$0xff]  ;;  %vm204_vm1 = vcmask 261120   ;;  %v2101_v7 = vld [vmem:[#allocation4] ss:$0 sm:$0xff]  ;;  %s2802_s12 = smov 104  }
  0x6f   :  { %2257 = vmatprep.subr.bf16.mxu0 %v2800_v0  ;;  %2259 = vmatprep.mubr.msk.bf16.mxu0 %vm2801_vm0, %v2800_v0  ;;  %v180_v5 = vpack.c.bf16 %v2960_v4, %v2958_v3  ;;  %s2803_s22 = smov 120   ;;  %s2804_s23 = smov 112   ;;  %vm276_vm2 = vcmask 64512   ;;  %v3015_v35 = vld [vmem:[%s3310_s1] sm:$0xff]  ;;  %vm474_vm3 = vcmask 130048   ;;  %v3021_v39 = vld [vmem:[%s3310_s1 + $0x8] sm:$0xff] }
  0x70   :  { %2244 = vmatpush3.bf16.msra.mxu1 %v2493_v1  ;;  %s2805_s26 = smov 96   ;;  %s2806_s1 = smov 64   ;;  %vm783_vm4 = vcmask 195584   ;;  %vm1011_vm5 = vcmask 523264   ;;  %vm2089_vm6 = vcmask 785408  }
  0x71   :  { %2245 = vmatprep.subr.bf16.mxu1 %v2800_v0  ;;  %s2807_s18 = smov 24   ;;  %s2808_s28 = smov 32  }
  0x74   :  { %2246 = vmatpush3.bf16.msra.mxu1 %v2494_v2 }
  0x75   :  { %2251 = vmatprep.subr.bf16.mxu1 %v2800_v0 }
  0x77   :  { %2248 = vmatmul.mubr.msk.bf16.vlgmr.msra.gmra.mxu1 %vm204_vm1, %v180_v5 }
  0x78   :  { %2253 = vmatprep.mubr.msk.bf16.mxu1 %vm2801_vm0, %v2800_v0 }
 0x137   :  { %v242_v6 = vpop.f32.mrf.mxu1 }
 0x138   :  { %v243_v10 = vadd.f32 %v2101_v7, %v242_v6 }
 0x139   :  { %v2249_v8 = vpop.f32.mrf.mxu1 }
 0x13b   :  { %v245_v9 = vpop.f32.mrf.mxu1 }
 0x13c   :  { %v246_v11 = vadd.f32 %v2101_v7, %v245_v9 }
 0x13d   :  { %v2250_v12 = vpop.f32.mrf.mxu1 }
 0x13e   :  { %v2443_v13 = vpack.i.bf16 %v246_v11, %v243_v10  ;;  %v2971_v14 = vpack.c.bf16 %v246_v11, %v243_v10 }
 0x140   :  { %2444 = vrot.lane.b32.xlu1 %v2443_v13, %s2802_s12  ;;  %2434 = vrot.lane.b32.xlu0 %v2443_v13, %s2803_s22 }
 0x144   :  { %2439 = vrot.lane.b32.xlu0 %v2443_v13, %s2804_s23  ;;  %274 = vrot.lane.b32.xlu1 %v2971_v14, %s2805_s26 }
 0x1b2   :  { %v2445_v15 = vpop.permute.xlu1 %2444  ;;  %v2435_v16 = vpop.permute.xlu0 %2434 }
 0x1b3   :  { %v2437_v17 = vunpack.i.h.bf16 %v2435_v16  ;;  %v2436_v18 = vunpack.i.l.bf16 %v2435_v16  ;;  %v2447_v19 = vunpack.i.h.bf16 %v2445_v15  ;;  %v2446_v20 = vunpack.i.l.bf16 %v2445_v15 }
 0x1b5   :  { %v2976_v21 = vpack.c.bf16 %v2437_v17, %v2436_v18  ;;  %v2981_v27 = vpack.c.bf16 %v2447_v19, %v2446_v20 }
 0x1b6   :  { %v2440_v22 = vpop.permute.xlu0 %2439  ;;  %v275_v23 = vpop.permute.xlu1 %274 }
 0x1b7   :  { %v2442_v24 = vunpack.i.h.bf16 %v2440_v22  ;;  %v2441_v25 = vunpack.i.l.bf16 %v2440_v22  ;;  %v281_v26 = vsel %vm276_vm2, %v275_v23, 0  ;;  %325 = vrot.lane.b32.xlu0 %v2976_v21, %s2805_s26 }
 0x1b8   :  { %2252 = vmatpush3.bf16.xpose.msra.mxu1 %v281_v26 }
 0x1b9   :  { %v2983_v28 = vpack.c.bf16 %v2442_v24, %v2441_v25  ;;  %2263 = vmatprep.subr.bf16.mxu1 %v2800_v0 }
 0x1bb   :  { %425 = vrot.lane.b32.xlu0 %v2981_v27, %s2805_s26  ;;  %375 = vrot.lane.b32.xlu1 %v2983_v28, %s2805_s26 }
 0x1bf   :  { %2254 = vmatmul.mubr.msk.bf16.vlgmr.msra.gmra.mxu1 %vm276_vm2, %v2971_v14 }
 0x1c0   :  { %2265 = vmatprep.mubr.msk.bf16.mxu1 %vm2801_vm0, %v2800_v0 }
 0x229   :  { %v326_v29 = vpop.permute.xlu0 %325 }
 0x22a   :  { %v331_v30 = vsel %vm276_vm2, %v326_v29, 0 }
 0x22b   :  { %2258 = vmatpush3.bf16.xpose.msra.mxu0 %v331_v30 }
 0x22c   :  { %2269 = vmatprep.subr.bf16.mxu0 %v2800_v0 }
 0x22d   :  { %v376_v31 = vpop.permute.xlu1 %375  ;;  %v426_v33 = vpop.permute.xlu0 %425 }
 0x22e   :  { %v381_v32 = vsel %vm276_vm2, %v376_v31, 0  ;;  %v431_v34 = vsel %vm276_vm2, %v426_v33, 0 }
 0x22f   :  { %2264 = vmatpush3.bf16.xpose.msra.mxu1 %v381_v32 }
 0x230   :  { %2275 = vmatprep.subr.bf16.mxu1 %v2800_v0 }
 0x232   :  { %2260 = vmatmul.mubr.msk.bf16.vlgmr.msra.gmra.mxu0 %vm276_vm2, %v2976_v21 }
 0x233   :  { %2270 = vmatpush3.bf16.xpose.msra.mxu0 %v431_v34  ;;  %2271 = vmatprep.mubr.msk.bf16.mxu0 %vm2801_vm0, %v2800_v0 }
 0x234   :  { %2281 = vmatprep.subr.bf16.mxu0 %v2800_v0 }
 0x236   :  { %2266 = vmatmul.mubr.msk.bf16.vlgmr.msra.gmra.mxu1 %vm276_vm2, %v2983_v28 }
 0x237   :  { %2277 = vmatprep.mubr.msk.bf16.mxu1 %vm2801_vm0, %v2800_v0 }
 0x23a   :  { %2272 = vmatmul.mubr.msk.bf16.vlgmr.msra.gmra.mxu0 %vm276_vm2, %v2981_v27 }
 0x23b   :  { %2283 = vmatprep.mubr.msk.bf16.mxu0 %vm2801_vm0, %v2800_v0 }
 0x27f   :  { %v317_v36 = vpop.f32.mrf.mxu1 }
 0x280   :  { %v318_v37 = vadd.f32 %v317_v36, %v3015_v35 }
 0x281   :  { %v2255_v38 = vpop.f32.mrf.mxu1 }
 0x282   :  { %v475_v40 = vsel %vm474_vm3, %v318_v37, -inf }
 0x283   :  { %476 = vmax.xlane.f32.xlu1 %v475_v40  ;;  %v320_v41 = vpop.f32.mrf.mxu1 }
 0x284   :  { %v321_v42 = vadd.f32 %v320_v41, %v3021_v39 }
 0x285   :  { %v2256_v43 = vpop.f32.mrf.mxu1 }
 0x286   :  { %v478_v44 = vsel %vm474_vm3, %v321_v42, -inf }
 0x287   :  { %479 = vmax.xlane.f32.xlu0 %v478_v44 }
 0x2f2   :  { %v367_v45 = vpop.f32.mrf.mxu0 }
 0x2f3   :  { %v368_v46 = vadd.f32 %v367_v45, %v3015_v35 }
 0x2f4   :  { %v2261_v47 = vpop.f32.mrf.mxu0 }
 0x2f5   :  { %v481_v48 = vsel %vm474_vm3, %v368_v46, -inf }
 0x2f6   :  { %v370_v49 = vpop.f32.mrf.mxu0  ;;  %482 = vmax.xlane.f32.xlu0 %v481_v48  ;;  %v417_v50 = vpop.f32.mrf.mxu1 }
 0x2f7   :  { %v371_v51 = vadd.f32 %v370_v49, %v3021_v39  ;;  %v418_v52 = vadd.f32 %v417_v50, %v3015_v35 }
 0x2f8   :  { %v2262_v53 = vpop.f32.mrf.mxu0  ;;  %v2267_v54 = vpop.f32.mrf.mxu1 }
 0x2f9   :  { %v484_v55 = vsel %vm474_vm3, %v371_v51, -inf  ;;  %v487_v56 = vsel %vm474_vm3, %v418_v52, -inf }
 0x2fa   :  { %v467_v57 = vpop.f32.mrf.mxu0  ;;  %485 = vmax.xlane.f32.xlu1 %v484_v55  ;;  %488 = vmax.xlane.f32.xlu0 %v487_v56  ;;  %v420_v58 = vpop.f32.mrf.mxu1 }
 0x2fb   :  { %v468_v59 = vadd.f32 %v467_v57, %v3015_v35  ;;  %v421_v60 = vadd.f32 %v420_v58, %v3021_v39 }
 0x2fc   :  { %v2268_v61 = vpop.f32.mrf.mxu1  ;;  %v2273_v62 = vpop.f32.mrf.mxu0 }
 0x2fd   :  { %v493_v63 = vsel %vm474_vm3, %v468_v59, -inf  ;;  %v490_v1 = vsel %vm474_vm3, %v421_v60, -inf }
 0x2fe   :  { %v470_v2 = vpop.f32.mrf.mxu0  ;;  %494 = vmax.xlane.f32.xlu0 %v493_v63  ;;  %491 = vmax.xlane.f32.xlu1 %v490_v1 }
 0x2ff   :  { %v471_v5 = vadd.f32 %v470_v2, %v3021_v39 }
 0x300   :  { %v2274_v6 = vpop.f32.mrf.mxu0 }
 0x301   :  { %v496_v7 = vsel %vm474_vm3, %v471_v5, -inf }
 0x302   :  { %497 = vmax.xlane.f32.xlu1 %v496_v7 }
 0x30c   :  { %v477_v8 = vpop.xlane.xlu1 %476 }
 0x30d   :  { %v499_v9 = vsub.f32 %v318_v37, %v477_v8 }
 0x30f   :  { %v507_v11 = vmul.f32 1.442695, %v499_v9 }
 0x310   :  { %v480_v10 = vpop.xlane.xlu0 %479 }
 0x311   :  { %v500_v12 = vsub.f32 %v321_v42, %v480_v10  ;;  %2513 = vpow2.f32 %v507_v11 }
 0x313   :  { %614 = vrot.lane.b32.xlu1 %v2976_v21, %s2806_s1  ;;  %v509_v13 = vmul.f32 1.442695, %v500_v12 }
 0x314   :  { %567 = vrot.lane.b32.xlu0 %v2971_v14, %s2806_s1 }
 0x315   :  { %2515 = vpow2.f32 %v509_v13 }
 0x31e   :  { %v2514_v15 = vpop.eup %2513 }
 0x31f   :  { %v523_v16 = vsel %vm474_vm3, %v2514_v15, 0.0 }
 0x322   :  { %v2516_v17 = vpop.eup %2515 }
 0x323   :  { %v526_v18 = vsel %vm474_vm3, %v2516_v17, 0.0 }
 0x333   :  { %524 = vadd.xlane.f32.xlu0 %v523_v16 }
 0x337   :  { %527 = vadd.xlane.f32.xlu1 %v526_v18 }
 0x37f   :  { %v483_v19 = vpop.xlane.xlu0 %482 }
 0x380   :  { %v501_v20 = vsub.f32 %v368_v46, %v483_v19 }
 0x382   :  { %v511_v21 = vmul.f32 1.442695, %v501_v20 }
 0x383   :  { %v486_v14 = vpop.xlane.xlu1 %485  ;;  %v489_v22 = vpop.xlane.xlu0 %488 }
 0x384   :  { %2517 = vpow2.f32 %v511_v21  ;;  %v502_v23 = vsub.f32 %v371_v51, %v486_v14  ;;  %v503_v24 = vsub.f32 %v418_v52, %v489_v22 }
 0x386   :  { %v513_v25 = vmul.f32 1.442695, %v502_v23  ;;  %v515_v26 = vmul.f32 1.442695, %v503_v24 }
 0x387   :  { %v495_v29 = vpop.xlane.xlu0 %494  ;;  %v492_v30 = vpop.xlane.xlu1 %491 }
 0x388   :  { %2519 = vpow2.f32 %v513_v25  ;;  %v505_v31 = vsub.f32 %v468_v59, %v495_v29  ;;  %v504_v32 = vsub.f32 %v421_v60, %v492_v30 }
 0x389   :  { %2521 = vpow2.f32 %v515_v26  ;;  %v2495_v26 = vld [vmem:[%s3313_s4 + $0x8] sm:$0xff]  }
 0x38a   :  { %v519_v33 = vmul.f32 1.442695, %v505_v31  ;;  %v517_v34 = vmul.f32 1.442695, %v504_v32  ;;  %v2496_v31 = vld [vmem:[%s3313_s4] sm:$0xff]  }
 0x38b   :  { %v568_v36 = vpop.permute.xlu0 %567  ;;  %v498_v37 = vpop.xlane.xlu1 %497 }
 0x38c   :  { %2523 = vpow2.f32 %v519_v33  ;;  %v506_v38 = vsub.f32 %v471_v5, %v498_v37  ;;  %2276 = vmatpush3.bf16.msra.mxu1 %v568_v36 }
 0x38d   :  { %2525 = vpow2.f32 %v517_v34  ;;  %2287 = vmatprep.subr.bf16.mxu1 %v2800_v0 }
 0x38e   :  { %v521_v40 = vmul.f32 1.442695, %v506_v38 }
 0x38f   :  { %v615_v41 = vpop.permute.xlu1 %614 }
 0x390   :  { %2527 = vpow2.f32 %v521_v40  ;;  %2282 = vmatpush3.bf16.msra.mxu0 %v615_v41 }
 0x391   :  { %v2518_v42 = vpop.eup %2517  ;;  %2293 = vmatprep.subr.bf16.mxu0 %v2800_v0 }
 0x392   :  { %v529_v43 = vsel %vm474_vm3, %v2518_v42, 0.0 }
 0x393   :  { %530 = vadd.xlane.f32.xlu0 %v529_v43 }
 0x395   :  { %v2520_v44 = vpop.eup %2519 }
 0x396   :  { %v2522_v45 = vpop.eup %2521  ;;  %v532_v46 = vsel %vm474_vm3, %v2520_v44, 0.0 }
 0x397   :  { %v535_v47 = vsel %vm474_vm3, %v2522_v45, 0.0  ;;  %533 = vadd.xlane.f32.xlu1 %v532_v46 }
 0x398   :  { %536 = vadd.xlane.f32.xlu0 %v535_v47 }
 0x399   :  { %v2524_v48 = vpop.eup %2523 }
 0x39a   :  { %v2526_v49 = vpop.eup %2525  ;;  %v541_v50 = vsel %vm474_vm3, %v2524_v48, 0.0 }
 0x39b   :  { %v538_v51 = vsel %vm474_vm3, %v2526_v49, 0.0 }
 0x39c   :  { %542 = vadd.xlane.f32.xlu0 %v541_v50  ;;  %539 = vadd.xlane.f32.xlu1 %v538_v51 }
 0x39d   :  { %v2528_v52 = vpop.eup %2527 }
 0x39e   :  { %v544_v53 = vsel %vm474_vm3, %v2528_v52, 0.0 }
 0x3a0   :  { %545 = vadd.xlane.f32.xlu1 %v544_v53 }
 0x3b1   :  { %661 = vrot.lane.b32.xlu1 %v2983_v28, %s2806_s1 }
 0x3b2   :  { %708 = vrot.lane.b32.xlu0 %v2981_v27, %s2806_s1 }
 0x3bc   :  { %v525_v54 = vpop.xlane.xlu0 %524 }
 0x3bd   :  { %2529 = vrcp.f32 %v525_v54 }
 0x3c0   :  { %v528_v55 = vpop.xlane.xlu1 %527 }
 0x3c1   :  { %2531 = vrcp.f32 %v528_v55 }
 0x3ca   :  { %v2530_v56 = vpop.eup %2529 }
 0x3cb   :  { %v555_v58 = vmul.f32 %v2530_v56, %v2514_v15 }
 0x3ce   :  { %v2532_v57 = vpop.eup %2531 }
 0x3cf   :  { %v556_v59 = vmul.f32 %v2532_v57, %v2516_v17 }
 0x3d1   :  { %v563_v60 = vpack.c.bf16 %v556_v59, %v555_v58 }
 0x3d3   :  { %2278 = vmatmul.mubr.msk.bf16.vlgmr.msra.gmra.mxu1 %vm474_vm3, %v563_v60 }
 0x3d4   :  { %2289 = vmatprep.mubr.msk.bf16.mxu1 %vm2801_vm0, %v2800_v0 }
 0x41c   :  { %v531_v61 = vpop.xlane.xlu0 %530 }
 0x41d   :  { %2533 = vrcp.f32 %v531_v61 }
 0x420   :  { %v534_v28 = vpop.xlane.xlu1 %533 }
 0x421   :  { %v537_v62 = vpop.xlane.xlu0 %536  ;;  %2535 = vrcp.f32 %v534_v28  ;;  %v2113_v28 = vld [vmem:[#allocation6] ss:$0 sm:$0xff] }
 0x422   :  { %2537 = vrcp.f32 %v537_v62 }
 0x425   :  { %v543_v27 = vpop.xlane.xlu0 %542  ;;  %v540_v63 = vpop.xlane.xlu1 %539 }
 0x426   :  { %2539 = vrcp.f32 %v540_v63 }
 0x427   :  { %2541 = vrcp.f32 %v543_v27 }
 0x429   :  { %v546_v1 = vpop.xlane.xlu1 %545  ;;  %v709_v11 = vpop.permute.xlu0 %708 }
 0x42a   :  { %2543 = vrcp.f32 %v546_v1  ;;  %v2534_v2 = vpop.eup %2533 }
 0x42b   :  { %v557_v7 = vmul.f32 %v2534_v2, %v2518_v42 }
 0x42d   :  { %v662_v5 = vpop.permute.xlu1 %661 }
 0x42e   :  { %v2536_v6 = vpop.eup %2535  ;;  %2288 = vmatpush3.bf16.msra.mxu1 %v662_v5 }
 0x42f   :  { %v558_v8 = vmul.f32 %v2536_v6, %v2520_v44  ;;  %2299 = vmatprep.subr.bf16.mxu1 %v2800_v0  ;;  %v2538_v10 = vpop.eup %2537 }
 0x430   :  { %v559_v15 = vmul.f32 %v2538_v10, %v2522_v45 }
 0x431   :  { %v564_v9 = vpack.c.bf16 %v558_v8, %v557_v7 }
 0x433   :  { %2284 = vmatmul.mubr.msk.bf16.vlgmr.msra.gmra.mxu0 %vm474_vm3, %v564_v9  ;;  %v2540_v12 = vpop.eup %2539 }
 0x434   :  { %2294 = vmatpush3.bf16.msra.mxu0 %v709_v11  ;;  %2295 = vmatprep.mubr.msk.bf16.mxu0 %vm2801_vm0, %v2800_v0  ;;  %v2542_v13 = vpop.eup %2541  ;;  %v560_v16 = vmul.f32 %v2540_v12, %v2526_v49 }
 0x435   :  { %2307 = vmatprep.subr.bf16.mxu0 %v2800_v0  ;;  %v561_v19 = vmul.f32 %v2542_v13, %v2524_v48 }
 0x436   :  { %v565_v18 = vpack.c.bf16 %v560_v16, %v559_v15 }
 0x437   :  { %v2544_v17 = vpop.eup %2543 }
 0x438   :  { %v562_v20 = vmul.f32 %v2544_v17, %v2528_v52  ;;  %2290 = vmatmul.mubr.msk.bf16.vlgmr.msra.gmra.mxu1 %vm474_vm3, %v565_v18 }
 0x439   :  { %2303 = vmatprep.mubr.msk.bf16.mxu1 %vm2801_vm0, %v2800_v0  ;;  %2300 = vmatpush3.bf16.msra.mxu1 %v2495_v26 }
 0x43a   :  { %v566_v21 = vpack.c.bf16 %v562_v20, %v561_v19  ;;  %2301 = vmatprep.subr.bf16.mxu1 %v2800_v0  ;;  %v2498_v20 = vld [vmem:[%s3315_s6] sm:$0xff]  }
 0x43c   :  { %2296 = vmatmul.mubr.msk.bf16.vlgmr.msra.gmra.mxu0 %vm474_vm3, %v566_v21  ;;  %v2499_v21 = vld [vmem:[%s3317_s8 + $0x18] sm:$0xff]  }
 0x43d   :  { %2311 = vmatprep.mubr.msk.bf16.mxu0 %vm2801_vm0, %v2800_v0  ;;  %2302 = vmatpush3.bf16.msra.mxu1 %v2496_v31  ;;  %v2117_v31 = vld [vmem:[#allocation10] ss:$0 sm:$0xff] }
 0x43e   :  { %2315 = vmatprep.subr.bf16.mxu1 %v2800_v0 }
 0x493   :  { %v607_v14 = vpop.f32.mrf.mxu1 }
 0x495   :  { %v2279_v22 = vpop.f32.mrf.mxu1 }
 0x497   :  { %v610_v23 = vpop.f32.mrf.mxu1 }
 0x499   :  { %v2280_v24 = vpop.f32.mrf.mxu1 }
 0x4f3   :  { %v654_v25 = vpop.f32.mrf.mxu0 }
 0x4f5   :  { %v2285_v29 = vpop.f32.mrf.mxu0 }
 0x4f7   :  { %v657_v30 = vpop.f32.mrf.mxu0 }
 0x4f8   :  { %v2448_v32 = vpack.i.bf16 %v657_v30, %v654_v25  ;;  %v701_v33 = vpop.f32.mrf.mxu1 }
 0x4f9   :  { %v2286_v34 = vpop.f32.mrf.mxu0 }
 0x4fa   :  { %2449 = vrot.lane.b32.xlu1 %v2448_v32, %s2795_s0  ;;  %v2291_v36 = vpop.f32.mrf.mxu1 }
 0x4fb   :  { %v2118_v36 = vld [vmem:[#allocation12] ss:$0 sm:$0xff] }
 0x4fc   :  { %v748_v37 = vpop.f32.mrf.mxu0  ;;  %v704_v38 = vpop.f32.mrf.mxu1 }
 0x4fd   :  { %v2453_v40 = vpack.i.bf16 %v704_v38, %v701_v33 }
 0x4fe   :  { %v2297_v41 = vpop.f32.mrf.mxu0  ;;  %v2292_v42 = vpop.f32.mrf.mxu1 }
 0x4ff   :  { %2454 = vrot.lane.b32.xlu0 %v2453_v40, %s2788_s24  ;;  %v2500_v42 = vld [vmem:[%s3317_s8 + $0x10] sm:$0xff]  }
 0x500   :  { %v751_v43 = vpop.f32.mrf.mxu0 }
 0x501   :  { %v2458_v44 = vpack.i.bf16 %v751_v43, %v748_v37  ;;  %v2501_v43 = vld [vmem:[%s3317_s8 + $0x8] sm:$0xff]  }
 0x502   :  { %v2298_v45 = vpop.f32.mrf.mxu0 }
 0x503   :  { %2459 = vrot.lane.b32.xlu1 %v2458_v44, %s2807_s18  ;;  %v2502_v44 = vld [vmem:[%s3317_s8] sm:$0xff]   ;;  %v2119_v45 = vld [vmem:[#allocation7] ss:$0 sm:$0xff] }
 0x56c   :  { %v2450_v46 = vpop.permute.xlu1 %2449 }
 0x56d   :  { %v2452_v47 = vunpack.i.h.bf16 %v2450_v46  ;;  %v2451_v48 = vunpack.i.l.bf16 %v2450_v46 }
 0x56f   :  { %v779_v53 = vsel %vm276_vm2, %v607_v14, %v2451_v48  ;;  %v780_v54 = vsel %vm276_vm2, %v610_v23, %v2452_v47 }
 0x571   :  { %v2455_v49 = vpop.permute.xlu0 %2454 }
 0x572   :  { %v2457_v50 = vunpack.i.h.bf16 %v2455_v49  ;;  %v2456_v51 = vunpack.i.l.bf16 %v2455_v49 }
 0x574   :  { %v782_v57 = vsel %vm474_vm3, %v780_v54, %v2457_v50  ;;  %v781_v58 = vsel %vm474_vm3, %v779_v53, %v2456_v51 }
 0x575   :  { %v2460_v52 = vpop.permute.xlu1 %2459 }
 0x576   :  { %v2462_v55 = vunpack.i.h.bf16 %v2460_v52  ;;  %v2461_v56 = vunpack.i.l.bf16 %v2460_v52 }
 0x578   :  { %v784_v59 = vsel %vm783_vm4, %v781_v58, %v2461_v56  ;;  %v785_v60 = vsel %vm783_vm4, %v782_v57, %v2462_v55  ;;  %v2123_v55 = vld [vmem:[#allocation9] ss:$0 sm:$0xff] }
 0x579   :  { %v786_v61 = vpack.c.bf16 %v785_v60, %v784_v59 }
 0x57b   :  { %2304 = vmatmul.mubr.msk.bf16.vlgmr.msra.gmra.mxu1 %vm204_vm1, %v786_v61 }
 0x57c   :  { %2323 = vmatprep.mubr.msk.bf16.mxu1 %vm2801_vm0, %v2800_v0  ;;  %2316 = vmatpush3.bf16.msra.mxu1 %v2499_v21 }
 0x57d   :  { %2317 = vmatprep.subr.bf16.mxu1 %v2800_v0 }
 0x580   :  { %2318 = vmatpush3.bf16.msra.mxu1 %v2500_v42 }
 0x581   :  { %2319 = vmatprep.subr.bf16.mxu1 %v2800_v0 }
 0x584   :  { %2320 = vmatpush3.bf16.msra.mxu1 %v2501_v43 }
 0x585   :  { %2321 = vmatprep.subr.bf16.mxu1 %v2800_v0 }
 0x588   :  { %2322 = vmatpush3.bf16.msra.mxu1 %v2502_v44 }
 0x589   :  { %2341 = vmatprep.subr.bf16.mxu1 %v2800_v0 }
 0x63b   :  { %v847_v62 = vpop.f32.mrf.mxu1 }
 0x63c   :  { %v848_v27 = vadd.f32 %v2113_v28, %v847_v62 }
 0x63d   :  { %v2305_v63 = vpop.f32.mrf.mxu1 }
 0x63e   :  { %v854_v1 = vadd.f32 %v848_v27, %v2958_v3 }
 0x63f   :  { %v850_v2 = vpop.f32.mrf.mxu1 }
 0x640   :  { %v851_v5 = vadd.f32 %v2113_v28, %v850_v2  ;;  %v858_v6 = vsel %vm204_vm1, %v854_v1, 0.0 }
 0x641   :  { %859 = vadd.xlane.f32.xlu0 %v858_v6  ;;  %v2306_v7 = vpop.f32.mrf.mxu1 }
 0x642   :  { %v855_v8 = vadd.f32 %v851_v5, %v2960_v4  ;;  %v2497_v4 = vld [vmem:[%s3315_s6 + $0x8] sm:$0xff]  }
 0x643   :  { %2308 = vmatpush3.bf16.msra.mxu0 %v2497_v4 }
 0x644   :  { %v861_v9 = vsel %vm204_vm1, %v855_v8, 0.0  ;;  %2309 = vmatprep.subr.bf16.mxu0 %v2800_v0 }
 0x645   :  { %862 = vadd.xlane.f32.xlu1 %v861_v9 }
 0x647   :  { %2310 = vmatpush3.bf16.msra.mxu0 %v2498_v20 }
 0x648   :  { %2327 = vmatprep.subr.bf16.mxu0 %v2800_v0 }
 0x6ca   :  { %v860_v10 = vpop.xlane.xlu0 %859 }
 0x6cb   :  { %v865_v11 = vmul.f32 0.03125, %v860_v10 }
 0x6cd   :  { %v867_v12 = vsub.f32 %v854_v1, %v865_v11 }
 0x6ce   :  { %v863_v13 = vpop.xlane.xlu1 %862 }
 0x6cf   :  { %v866_v15 = vmul.f32 0.03125, %v863_v13  ;;  %v869_v16 = vmul.f32 %v867_v12, %v867_v12  ;;  %v2503_v13 = vld [vmem:[%s3311_s2 + $0x18] sm:$0xff]  }
 0x6d1   :  { %v868_v17 = vsub.f32 %v855_v8, %v866_v15  ;;  %v871_v3 = vsel %vm204_vm1, %v869_v16, 0.0  ;;  %v2504_v15 = vld [vmem:[%s3311_s2 + $0x10] sm:$0xff]  }
 0x6d2   :  { %872 = vadd.xlane.f32.xlu0 %v871_v3 }
 0x6d3   :  { %v870_v18 = vmul.f32 %v868_v17, %v868_v17 }
 0x6d5   :  { %v874_v19 = vsel %vm204_vm1, %v870_v18, 0.0 }
 0x6d6   :  { %875 = vadd.xlane.f32.xlu0 %v874_v19 }
 0x75b   :  { %v873_v14 = vpop.xlane.xlu0 %872 }
 0x75c   :  { %v877_v22 = vmul.f32 0.03125, %v873_v14  ;;  %v2129_v14 = vld [vmem:[#allocation13] ss:$0 sm:$0xff] }
 0x75e   :  { %v879_v23 = vadd.f32 1e-05, %v877_v22 }
 0x75f   :  { %v876_v24 = vpop.xlane.xlu0 %875 }
 0x760   :  { %2545 = vrsqrt.f32 %v879_v23  ;;  %v878_v25 = vmul.f32 0.03125, %v876_v24 }
 0x762   :  { %v880_v26 = vadd.f32 1e-05, %v878_v25  ;;  %v2130_v25 = vld [vmem:[#allocation15] ss:$0 sm:$0xff] }
 0x764   :  { %2547 = vrsqrt.f32 %v880_v26 }
 0x76d   :  { %v2546_v29 = vpop.eup %2545 }
 0x76e   :  { %v883_v30 = vmul.f32 %v2546_v29, %v867_v12 }
 0x770   :  { %v891_v34 = vmul.f32 %v2117_v31, %v883_v30 }
 0x771   :  { %v2548_v32 = vpop.eup %2547 }
 0x772   :  { %v884_v33 = vmul.f32 %v2548_v32, %v868_v17  ;;  %v899_v38 = vadd.f32 %v2118_v36, %v891_v34 }
 0x774   :  { %v892_v37 = vmul.f32 %v2117_v31, %v884_v33  ;;  %v2135_v33 = vld [vmem:[#allocation4 + $0x1] ss:$0 sm:$0xff] }
 0x776   :  { %v900_v40 = vadd.f32 %v2118_v36, %v892_v37 }
 0x778   :  { %v901_v41 = vpack.c.bf16 %v900_v40, %v899_v38 }
 0x77a   :  { %2312 = vmatmul.mubr.msk.bf16.vlgmr.msra.gmra.mxu0 %vm204_vm1, %v901_v41 }
 0x77b   :  { %2331 = vmatprep.mubr.msk.bf16.mxu0 %vm2801_vm0, %v2800_v0  ;;  %2328 = vmatpush3.bf16.msra.mxu0 %v2503_v13 }
 0x77c   :  { %2329 = vmatprep.subr.bf16.mxu0 %v2800_v0 }
 0x77f   :  { %2330 = vmatpush3.bf16.msra.mxu0 %v2504_v15 }
 0x780   :  { %2335 = vmatprep.subr.bf16.mxu0 %v2800_v0 }
 0x83a   :  { %v962_v46 = vpop.f32.mrf.mxu0 }
 0x83b   :  { %v963_v48 = vadd.f32 %v2119_v45, %v962_v46 }
 0x83c   :  { %v2313_v47 = vpop.f32.mrf.mxu0 }
 0x83d   :  { %v969_v52 = vmax.f32 %v963_v48, 0.0 }
 0x83e   :  { %v965_v49 = vpop.f32.mrf.mxu0 }
 0x83f   :  { %v966_v50 = vadd.f32 %v2119_v45, %v965_v49 }
 0x840   :  { %v2314_v51 = vpop.f32.mrf.mxu0 }
 0x841   :  { %v970_v53 = vmax.f32 %v966_v50, 0.0 }
 0x843   :  { %v971_v54 = vpack.c.bf16 %v970_v53, %v969_v52 }
 0x845   :  { %2324 = vmatmul.mubr.msk.bf16.vlgmr.msra.gmra.mxu1 %vm1011_vm5, %v971_v54 }
 0x846   :  { %2343 = vmatprep.mubr.msk.bf16.mxu1 %vm2801_vm0, %v2800_v0 }
 0x905   :  { %v1049_v56 = vpop.f32.mrf.mxu1 }
 0x906   :  { %v1050_v57 = vadd.f32 %v2123_v55, %v1049_v56 }
 0x907   :  { %v2325_v58 = vpop.f32.mrf.mxu1 }
 0x908   :  { %v1056_v59 = vadd.f32 %v1050_v57, %v899_v38 }
 0x909   :  { %v1052_v60 = vpop.f32.mrf.mxu1 }
 0x90a   :  { %v1053_v61 = vadd.f32 %v2123_v55, %v1052_v60  ;;  %v1060_v28 = vsel %vm204_vm1, %v1056_v59, 0.0 }
 0x90b   :  { %1061 = vadd.xlane.f32.xlu1 %v1060_v28  ;;  %v2326_v62 = vpop.f32.mrf.mxu1 }
 0x90c   :  { %v1057_v27 = vadd.f32 %v1053_v61, %v900_v40 }
 0x90e   :  { %v1063_v63 = vsel %vm204_vm1, %v1057_v27, 0.0 }
 0x90f   :  { %1064 = vadd.xlane.f32.xlu0 %v1063_v63 }
 0x994   :  { %v1062_v1 = vpop.xlane.xlu1 %1061 }
 0x995   :  { %v1066_v2 = vmul.f32 0.03125, %v1062_v1 }
 0x997   :  { %v1068_v5 = vsub.f32 %v1056_v59, %v1066_v2 }
 0x998   :  { %v1065_v6 = vpop.xlane.xlu0 %1064 }
 0x999   :  { %v1067_v7 = vmul.f32 0.03125, %v1065_v6  ;;  %v1070_v8 = vmul.f32 %v1068_v5, %v1068_v5 }
 0x99b   :  { %v1069_v9 = vsub.f32 %v1057_v27, %v1067_v7  ;;  %v1072_v10 = vsel %vm204_vm1, %v1070_v8, 0.0 }
 0x99c   :  { %1073 = vadd.xlane.f32.xlu1 %v1072_v10 }
 0x99d   :  { %v1071_v11 = vmul.f32 %v1069_v9, %v1069_v9 }
 0x99f   :  { %v1075_v12 = vsel %vm204_vm1, %v1071_v11, 0.0 }
 0x9a0   :  { %1076 = vadd.xlane.f32.xlu0 %v1075_v12 }
 0xa25   :  { %v1074_v16 = vpop.xlane.xlu1 %1073 }
 0xa26   :  { %v1078_v17 = vmul.f32 0.03125, %v1074_v16 }
 0xa28   :  { %v1080_v3 = vadd.f32 1e-05, %v1078_v17 }
 0xa29   :  { %v1077_v18 = vpop.xlane.xlu0 %1076 }
 0xa2a   :  { %2549 = vrsqrt.f32 %v1080_v3  ;;  %v1079_v19 = vmul.f32 0.03125, %v1077_v18 }
 0xa2c   :  { %v1081_v4 = vadd.f32 1e-05, %v1079_v19 }
 0xa2e   :  { %2551 = vrsqrt.f32 %v1081_v4 }
 0xa37   :  { %v2550_v20 = vpop.eup %2549 }
 0xa38   :  { %v1084_v21 = vmul.f32 %v2550_v20, %v1068_v5 }
 0xa3a   :  { %v1092_v24 = vmul.f32 %v2129_v14, %v1084_v21 }
 0xa3b   :  { %v2552_v22 = vpop.eup %2551 }
 0xa3c   :  { %v1085_v23 = vmul.f32 %v2552_v22, %v1069_v9  ;;  %v3138_v29 = vadd.f32 %v2130_v25, %v1092_v24 }
 0xa3e   :  { %v1093_v26 = vmul.f32 %v2129_v14, %v1085_v23 }
 0xa40   :  { %v3140_v30 = vadd.f32 %v2130_v25, %v1093_v26 }
 0xa42   :  { %v1102_v31 = vpack.c.bf16 %v3140_v30, %v3138_v29 }
 0xa44   :  { %2332 = vmatmul.mubr.msk.bf16.vlgmr.msra.gmra.mxu0 %vm204_vm1, %v1102_v31 }
 0xa45   :  { %2337 = vmatprep.mubr.msk.bf16.mxu0 %vm2801_vm0, %v2800_v0 }
 0xb04   :  { %v1165_v32 = vpop.f32.mrf.mxu0 }
 0xb05   :  { %v1166_v37 = vadd.f32 %v2135_v33, %v1165_v32 }
 0xb06   :  { %v2333_v34 = vpop.f32.mrf.mxu0 }
 0xb08   :  { %v1168_v36 = vpop.f32.mrf.mxu0 }
 0xb09   :  { %v1169_v38 = vadd.f32 %v2135_v33, %v1168_v36 }
 0xb0a   :  { %v2334_v40 = vpop.f32.mrf.mxu0 }
 0xb0b   :  { %v2468_v41 = vpack.i.bf16 %v1169_v38, %v1166_v37  ;;  %v3150_v42 = vpack.c.bf16 %v1169_v38, %v1166_v37 }
 0xb0d   :  { %2469 = vrot.lane.b32.xlu0 %v2468_v41, %s2804_s23  ;;  %2464 = vrot.lane.b32.xlu1 %v2468_v41, %s2803_s22 }
 0xb11   :  { %2474 = vrot.lane.b32.xlu1 %v2468_v41, %s2802_s12 }
 0xb15   :  { %1197 = vrot.lane.b32.xlu1 %v3150_v42, %s2805_s26 }
 0xb7f   :  { %v2470_v43 = vpop.permute.xlu0 %2469  ;;  %v2465_v44 = vpop.permute.xlu1 %2464 }
 0xb80   :  { %v2472_v45 = vunpack.i.h.bf16 %v2470_v43  ;;  %v2471_v46 = vunpack.i.l.bf16 %v2470_v43  ;;  %v2467_v47 = vunpack.i.h.bf16 %v2465_v44  ;;  %v2466_v48 = vunpack.i.l.bf16 %v2465_v44 }
 0xb82   :  { %v3154_v49 = vpack.c.bf16 %v2472_v45, %v2471_v46  ;;  %v3156_v50 = vpack.c.bf16 %v2467_v47, %v2466_v48 }
 0xb83   :  { %v2475_v51 = vpop.permute.xlu1 %2474 }
 0xb84   :  { %v2477_v52 = vunpack.i.h.bf16 %v2475_v51  ;;  %v2476_v53 = vunpack.i.l.bf16 %v2475_v51  ;;  %1247 = vrot.lane.b32.xlu0 %v3156_v50, %s2805_s26  ;;  %1297 = vrot.lane.b32.xlu1 %v3154_v49, %s2805_s26 }
 0xb86   :  { %v3162_v54 = vpack.c.bf16 %v2477_v52, %v2476_v53 }
 0xb87   :  { %v1198_v55 = vpop.permute.xlu1 %1197 }
 0xb88   :  { %v1203_v56 = vsel %vm276_vm2, %v1198_v55, 0  ;;  %1347 = vrot.lane.b32.xlu0 %v3162_v54, %s2805_s26 }
 0xb89   :  { %2336 = vmatpush3.bf16.xpose.msra.mxu0 %v1203_v56 }
 0xb8a   :  { %2347 = vmatprep.subr.bf16.mxu0 %v2800_v0 }
 0xb90   :  { %2338 = vmatmul.mubr.msk.bf16.vlgmr.msra.gmra.mxu0 %vm276_vm2, %v3150_v42 }
 0xb91   :  { %2349 = vmatprep.mubr.msk.bf16.mxu0 %vm2801_vm0, %v2800_v0 }
 0xbf6   :  { %v1248_v57 = vpop.permute.xlu0 %1247  ;;  %v1298_v58 = vpop.permute.xlu1 %1297 }
 0xbf7   :  { %v1253_v59 = vsel %vm276_vm2, %v1248_v57, 0  ;;  %v1303_v60 = vsel %vm276_vm2, %v1298_v58, 0 }
 0xbf8   :  { %2342 = vmatpush3.bf16.xpose.msra.mxu1 %v1253_v59  ;;  %2348 = vmatpush3.bf16.xpose.msra.mxu0 %v1303_v60 }
 0xbf9   :  { %2353 = vmatprep.subr.bf16.mxu1 %v2800_v0  ;;  %2359 = vmatprep.subr.bf16.mxu0 %v2800_v0 }
 0xbfa   :  { %v1348_v61 = vpop.permute.xlu0 %1347 }
 0xbfb   :  { %v1353_v28 = vsel %vm276_vm2, %v1348_v61, 0 }
 0xbff   :  { %2344 = vmatmul.mubr.msk.bf16.vlgmr.msra.gmra.mxu1 %vm276_vm2, %v3156_v50  ;;  %2350 = vmatmul.mubr.msk.bf16.vlgmr.msra.gmra.mxu0 %vm276_vm2, %v3154_v49 }
 0xc00   :  { %2354 = vmatpush3.bf16.xpose.msra.mxu1 %v1353_v28  ;;  %2355 = vmatprep.mubr.msk.bf16.mxu1 %vm2801_vm0, %v2800_v0 }
 0xc01   :  { %2365 = vmatprep.subr.bf16.mxu1 %v2800_v0  ;;  %2361 = vmatprep.mubr.msk.bf16.mxu0 %vm2801_vm0, %v2800_v0 }
 0xc07   :  { %2356 = vmatmul.mubr.msk.bf16.vlgmr.msra.gmra.mxu1 %vm276_vm2, %v3162_v54 }
 0xc08   :  { %2367 = vmatprep.mubr.msk.bf16.mxu1 %vm2801_vm0, %v2800_v0 }
 0xc50   :  { %v1239_v62 = vpop.f32.mrf.mxu0 }
 0xc51   :  { %v1240_v27 = vadd.f32 %v1239_v62, %v3015_v35 }
 0xc52   :  { %v2339_v63 = vpop.f32.mrf.mxu0 }
 0xc53   :  { %v1396_v1 = vsel %vm474_vm3, %v1240_v27, -inf }
 0xc54   :  { %1397 = vmax.xlane.f32.xlu1 %v1396_v1  ;;  %v1242_v2 = vpop.f32.mrf.mxu0 }
 0xc55   :  { %v1243_v5 = vadd.f32 %v1242_v2, %v3021_v39 }
 0xc56   :  { %v2340_v6 = vpop.f32.mrf.mxu0 }
 0xc57   :  { %v1399_v7 = vsel %vm474_vm3, %v1243_v5, -inf }
 0xc58   :  { %1400 = vmax.xlane.f32.xlu0 %v1399_v7 }
 0xcbf   :  { %v1289_v8 = vpop.f32.mrf.mxu1  ;;  %v1339_v9 = vpop.f32.mrf.mxu0 }
 0xcc0   :  { %v1290_v10 = vadd.f32 %v1289_v8, %v3015_v35  ;;  %v1340_v13 = vadd.f32 %v1339_v9, %v3015_v35 }
 0xcc1   :  { %v2345_v11 = vpop.f32.mrf.mxu1  ;;  %v2351_v12 = vpop.f32.mrf.mxu0 }
 0xcc2   :  { %v1402_v15 = vsel %vm474_vm3, %v1290_v10, -inf  ;;  %v1408_v20 = vsel %vm474_vm3, %v1340_v13, -inf }
 0xcc3   :  { %v1342_v16 = vpop.f32.mrf.mxu0  ;;  %1403 = vmax.xlane.f32.xlu0 %v1402_v15  ;;  %v1292_v17 = vpop.f32.mrf.mxu1 }
 0xcc4   :  { %v1293_v3 = vadd.f32 %v1292_v17, %v3021_v39  ;;  %v1343_v4 = vadd.f32 %v1342_v16, %v3021_v39 }
 0xcc5   :  { %v2346_v18 = vpop.f32.mrf.mxu1  ;;  %v2352_v19 = vpop.f32.mrf.mxu0 }
 0xcc6   :  { %v1405_v21 = vsel %vm474_vm3, %v1293_v3, -inf  ;;  %v1411_v24 = vsel %vm474_vm3, %v1343_v4, -inf }
 0xcc7   :  { %1409 = vmax.xlane.f32.xlu0 %v1408_v20  ;;  %1406 = vmax.xlane.f32.xlu1 %v1405_v21  ;;  %v1389_v14 = vpop.f32.mrf.mxu1 }
 0xcc8   :  { %v1390_v22 = vadd.f32 %v1389_v14, %v3015_v35 }
 0xcc9   :  { %v2357_v23 = vpop.f32.mrf.mxu1 }
 0xcca   :  { %v1414_v25 = vsel %vm474_vm3, %v1390_v22, -inf }
 0xccb   :  { %1412 = vmax.xlane.f32.xlu1 %v1411_v24  ;;  %1415 = vmax.xlane.f32.xlu0 %v1414_v25  ;;  %v1392_v26 = vpop.f32.mrf.mxu1 }
 0xccc   :  { %v1393_v31 = vadd.f32 %v1392_v26, %v3021_v39 }
 0xccd   :  { %v2358_v32 = vpop.f32.mrf.mxu1 }
 0xcce   :  { %v1417_v33 = vsel %vm474_vm3, %v1393_v31, -inf }
 0xccf   :  { %1418 = vmax.xlane.f32.xlu1 %v1417_v33 }
 0xcdd   :  { %v1398_v35 = vpop.xlane.xlu1 %1397 }
 0xcde   :  { %v1420_v34 = vsub.f32 %v1240_v27, %v1398_v35 }
 0xce0   :  { %1535 = vrot.lane.b32.xlu1 %v3156_v50, %s2806_s1  ;;  %v1428_v37 = vmul.f32 1.442695, %v1420_v34 }
 0xce1   :  { %1488 = vrot.lane.b32.xlu0 %v3150_v42, %s2806_s1  ;;  %v1401_v36 = vpop.xlane.xlu0 %1400 }
 0xce2   :  { %v1421_v38 = vsub.f32 %v1243_v5, %v1401_v36  ;;  %2553 = vpow2.f32 %v1428_v37 }
 0xce4   :  { %v1430_v40 = vmul.f32 1.442695, %v1421_v38 }
 0xce6   :  { %2555 = vpow2.f32 %v1430_v40 }
 0xcef   :  { %v2554_v41 = vpop.eup %2553 }
 0xcf0   :  { %v1444_v39 = vsel %vm474_vm3, %v2554_v41, 0.0 }
 0xcf3   :  { %v2556_v43 = vpop.eup %2555 }
 0xcf4   :  { %v1447_v44 = vsel %vm474_vm3, %v2556_v43, 0.0 }
 0xd00   :  { %1445 = vadd.xlane.f32.xlu0 %v1444_v39 }
 0xd04   :  { %1448 = vadd.xlane.f32.xlu1 %v1447_v44 }
 0xd4c   :  { %v1404_v45 = vpop.xlane.xlu0 %1403 }
 0xd4d   :  { %v1422_v46 = vsub.f32 %v1290_v10, %v1404_v45 }
 0xd4f   :  { %v1432_v47 = vmul.f32 1.442695, %v1422_v46 }
 0xd50   :  { %v1410_v42 = vpop.xlane.xlu0 %1409  ;;  %v1407_v48 = vpop.xlane.xlu1 %1406 }
 0xd51   :  { %2557 = vpow2.f32 %v1432_v47  ;;  %v1424_v50 = vsub.f32 %v1340_v13, %v1410_v42  ;;  %v1423_v51 = vsub.f32 %v1293_v3, %v1407_v48 }
 0xd53   :  { %v1436_v52 = vmul.f32 1.442695, %v1424_v50  ;;  %v1434_v53 = vmul.f32 1.442695, %v1423_v51  ;;  %v2505_v50 = vld [vmem:[%s3313_s4 + $0x18] sm:$0xff]  }
 0xd54   :  { %v1413_v55 = vpop.xlane.xlu1 %1412  ;;  %v1416_v56 = vpop.xlane.xlu0 %1415 }
 0xd55   :  { %2559 = vpow2.f32 %v1436_v52  ;;  %v1425_v57 = vsub.f32 %v1343_v4, %v1413_v55  ;;  %v1426_v58 = vsub.f32 %v1390_v22, %v1416_v56 }
 0xd56   :  { %2561 = vpow2.f32 %v1434_v53  ;;  %v2506_v53 = vld [vmem:[%s3313_s4 + $0x10] sm:$0xff]  }
 0xd57   :  { %v1438_v59 = vmul.f32 1.442695, %v1425_v57  ;;  %v1440_v60 = vmul.f32 1.442695, %v1426_v58 }
 0xd58   :  { %v1489_v61 = vpop.permute.xlu0 %1488  ;;  %v1419_v28 = vpop.xlane.xlu1 %1418 }
 0xd59   :  { %2563 = vpow2.f32 %v1438_v59  ;;  %v1427_v62 = vsub.f32 %v1393_v31, %v1419_v28  ;;  %2360 = vmatpush3.bf16.msra.mxu0 %v1489_v61 }
 0xd5a   :  { %2565 = vpow2.f32 %v1440_v60  ;;  %2371 = vmatprep.subr.bf16.mxu0 %v2800_v0 }
 0xd5b   :  { %v1442_v27 = vmul.f32 1.442695, %v1427_v62 }
 0xd5c   :  { %v1536_v63 = vpop.permute.xlu1 %1535 }
 0xd5d   :  { %2567 = vpow2.f32 %v1442_v27  ;;  %2366 = vmatpush3.bf16.msra.mxu1 %v1536_v63 }
 0xd5e   :  { %v2558_v1 = vpop.eup %2557  ;;  %2377 = vmatprep.subr.bf16.mxu1 %v2800_v0 }
 0xd5f   :  { %v1450_v2 = vsel %vm474_vm3, %v2558_v1, 0.0 }
 0xd60   :  { %1451 = vadd.xlane.f32.xlu0 %v1450_v2 }
 0xd62   :  { %v2560_v5 = vpop.eup %2559 }
 0xd63   :  { %v2562_v6 = vpop.eup %2561  ;;  %v1456_v7 = vsel %vm474_vm3, %v2560_v5, 0.0 }
 0xd64   :  { %1457 = vadd.xlane.f32.xlu0 %v1456_v7  ;;  %v1453_v8 = vsel %vm474_vm3, %v2562_v6, 0.0 }
 0xd65   :  { %1454 = vadd.xlane.f32.xlu1 %v1453_v8 }
 0xd66   :  { %v2564_v9 = vpop.eup %2563 }
 0xd67   :  { %v2566_v10 = vpop.eup %2565  ;;  %v1459_v11 = vsel %vm474_vm3, %v2564_v9, 0.0 }
 0xd68   :  { %v1462_v12 = vsel %vm474_vm3, %v2566_v10, 0.0 }
 0xd69   :  { %1463 = vadd.xlane.f32.xlu0 %v1462_v12  ;;  %1460 = vadd.xlane.f32.xlu1 %v1459_v11 }
 0xd6a   :  { %v2568_v13 = vpop.eup %2567 }
 0xd6b   :  { %v1465_v15 = vsel %vm474_vm3, %v2568_v13, 0.0 }
 0xd6d   :  { %1466 = vadd.xlane.f32.xlu1 %v1465_v15 }
 0xd7e   :  { %1582 = vrot.lane.b32.xlu1 %v3154_v49, %s2806_s1 }
 0xd7f   :  { %1629 = vrot.lane.b32.xlu0 %v3162_v54, %s2806_s1 }
 0xd89   :  { %v1446_v16 = vpop.xlane.xlu0 %1445 }
 0xd8a   :  { %2569 = vrcp.f32 %v1446_v16 }
 0xd8d   :  { %v1449_v17 = vpop.xlane.xlu1 %1448 }
 0xd8e   :  { %2571 = vrcp.f32 %v1449_v17 }
 0xd97   :  { %v2570_v3 = vpop.eup %2569 }
 0xd98   :  { %v1476_v19 = vmul.f32 %v2570_v3, %v2554_v41 }
 0xd9b   :  { %v2572_v18 = vpop.eup %2571 }
 0xd9c   :  { %v1477_v4 = vmul.f32 %v2572_v18, %v2556_v43 }
 0xd9e   :  { %v1484_v20 = vpack.c.bf16 %v1477_v4, %v1476_v19 }
 0xda0   :  { %2362 = vmatmul.mubr.msk.bf16.vlgmr.msra.gmra.mxu0 %vm474_vm3, %v1484_v20  ;;  %v2151_v20 = vld [vmem:[#allocation6 + $0x1] ss:$0 sm:$0xff] }
 0xda1   :  { %2373 = vmatprep.mubr.msk.bf16.mxu0 %vm2801_vm0, %v2800_v0 }
 0xde9   :  { %v1452_v21 = vpop.xlane.xlu0 %1451 }
 0xdea   :  { %2573 = vrcp.f32 %v1452_v21 }
 0xded   :  { %v1458_v49 = vpop.xlane.xlu0 %1457 }
 0xdee   :  { %v1455_v14 = vpop.xlane.xlu1 %1454 }
 0xdef   :  { %2575 = vrcp.f32 %v1455_v14 }
 0xdf0   :  { %2577 = vrcp.f32 %v1458_v49 }
 0xdf2   :  { %v1464_v54 = vpop.xlane.xlu0 %1463  ;;  %v1461_v22 = vpop.xlane.xlu1 %1460 }
 0xdf3   :  { %2579 = vrcp.f32 %v1461_v22 }
 0xdf4   :  { %2581 = vrcp.f32 %v1464_v54 }
 0xdf6   :  { %v1467_v23 = vpop.xlane.xlu1 %1466  ;;  %v1630_v36 = vpop.permute.xlu0 %1629 }
 0xdf7   :  { %2583 = vrcp.f32 %v1467_v23  ;;  %v2574_v24 = vpop.eup %2573 }
 0xdf8   :  { %v1478_v31 = vmul.f32 %v2574_v24, %v2558_v1 }
 0xdfa   :  { %v1583_v25 = vpop.permute.xlu1 %1582 }
 0xdfb   :  { %2372 = vmatpush3.bf16.msra.mxu0 %v1583_v25 }
 0xdfc   :  { %v2576_v26 = vpop.eup %2575  ;;  %2383 = vmatprep.subr.bf16.mxu0 %v2800_v0 }
 0xdfd   :  { %v1479_v32 = vmul.f32 %v2576_v26, %v2562_v6  ;;  %v2578_v33 = vpop.eup %2577 }
 0xdfe   :  { %v1480_v38 = vmul.f32 %v2578_v33, %v2560_v5 }
 0xdff   :  { %v1485_v35 = vpack.c.bf16 %v1479_v32, %v1478_v31 }
 0xe00   :  { %v2580_v34 = vpop.eup %2579 }
 0xe01   :  { %2368 = vmatmul.mubr.msk.bf16.vlgmr.msra.gmra.mxu1 %vm474_vm3, %v1485_v35  ;;  %v2582_v37 = vpop.eup %2581  ;;  %v1481_v40 = vmul.f32 %v2580_v34, %v2564_v9 }
 0xe02   :  { %2378 = vmatpush3.bf16.msra.mxu1 %v1630_v36  ;;  %2379 = vmatprep.mubr.msk.bf16.mxu1 %vm2801_vm0, %v2800_v0  ;;  %v1482_v43 = vmul.f32 %v2582_v37, %v2566_v10 }
 0xe03   :  { %2391 = vmatprep.subr.bf16.mxu1 %v2800_v0  ;;  %v1486_v39 = vpack.c.bf16 %v1481_v40, %v1480_v38 }
 0xe04   :  { %v2584_v41 = vpop.eup %2583 }
 0xe05   :  { %v1483_v44 = vmul.f32 %v2584_v41, %v2568_v13  ;;  %2374 = vmatmul.mubr.msk.bf16.vlgmr.msra.gmra.mxu0 %vm474_vm3, %v1486_v39  ;;  %v2508_v39 = vld [vmem:[%s3315_s6 + $0x10] sm:$0xff]  }
 0xe06   :  { %2387 = vmatprep.mubr.msk.bf16.mxu0 %vm2801_vm0, %v2800_v0  ;;  %2384 = vmatpush3.bf16.msra.mxu0 %v2505_v50 }
 0xe07   :  { %v1487_v45 = vpack.c.bf16 %v1483_v44, %v1482_v43  ;;  %2385 = vmatprep.subr.bf16.mxu0 %v2800_v0  ;;  %v2509_v43 = vld [vmem:[%s3317_s8 + $0x38] sm:$0xff]  }
 0xe09   :  { %2380 = vmatmul.mubr.msk.bf16.vlgmr.msra.gmra.mxu1 %vm474_vm3, %v1487_v45 }
 0xe0a   :  { %2395 = vmatprep.mubr.msk.bf16.mxu1 %vm2801_vm0, %v2800_v0  ;;  %2386 = vmatpush3.bf16.msra.mxu0 %v2506_v53 }
 0xe0b   :  { %2399 = vmatprep.subr.bf16.mxu0 %v2800_v0 }
 0xe60   :  { %v1528_v46 = vpop.f32.mrf.mxu0 }
 0xe62   :  { %v2363_v47 = vpop.f32.mrf.mxu0 }
 0xe64   :  { %v1531_v42 = vpop.f32.mrf.mxu0 }
 0xe66   :  { %v2364_v48 = vpop.f32.mrf.mxu0 }
 0xec1   :  { %v1575_v51 = vpop.f32.mrf.mxu1 }
 0xec3   :  { %v2369_v52 = vpop.f32.mrf.mxu1 }
 0xec4   :  { %v2155_v52 = vld [vmem:[#allocation10 + $0x1] ss:$0 sm:$0xff] }
 0xec5   :  { %v1578_v55 = vpop.f32.mrf.mxu1  ;;  %v1622_v57 = vpop.f32.mrf.mxu0 }
 0xec6   :  { %v2478_v56 = vpack.i.bf16 %v1578_v55, %v1575_v51 }
 0xec7   :  { %v2370_v58 = vpop.f32.mrf.mxu1  ;;  %v2375_v59 = vpop.f32.mrf.mxu0 }
 0xec8   :  { %2479 = vrot.lane.b32.xlu1 %v2478_v56, %s2795_s0 }
 0xec9   :  { %v1669_v60 = vpop.f32.mrf.mxu1  ;;  %v1625_v61 = vpop.f32.mrf.mxu0 }
 0xeca   :  { %v2483_v28 = vpack.i.bf16 %v1625_v61, %v1622_v57  ;;  %v2156_v57 = vld [vmem:[#allocation12 + $0x1] ss:$0 sm:$0xff] }
 0xecb   :  { %v2381_v62 = vpop.f32.mrf.mxu1  ;;  %v2376_v27 = vpop.f32.mrf.mxu0 }
 0xecc   :  { %2484 = vrot.lane.b32.xlu0 %v2483_v28, %s2788_s24  ;;  %v2510_v28 = vld [vmem:[%s3317_s8 + $0x30] sm:$0xff]   ;;  %v2511_v62 = vld [vmem:[%s3317_s8 + $0x28] sm:$0xff]   ;;  %v2512_v27 = vld [vmem:[%s3317_s8 + $0x20] sm:$0xff]  }
 0xecd   :  { %v1672_v63 = vpop.f32.mrf.mxu1 }
 0xece   :  { %v2488_v1 = vpack.i.bf16 %v1672_v63, %v1669_v60  ;;  %v2161_v63 = vld [vmem:[#allocation7 + $0x1] ss:$0 sm:$0xff] }
 0xecf   :  { %v2382_v2 = vpop.f32.mrf.mxu1 }
 0xed0   :  { %2489 = vrot.lane.b32.xlu1 %v2488_v1, %s2807_s18 }
 0xf3a   :  { %v2480_v5 = vpop.permute.xlu1 %2479 }
 0xf3b   :  { %v2482_v6 = vunpack.i.h.bf16 %v2480_v5  ;;  %v2481_v7 = vunpack.i.l.bf16 %v2480_v5 }
 0xf3d   :  { %v1701_v12 = vsel %vm276_vm2, %v1531_v42, %v2482_v6  ;;  %v1700_v13 = vsel %vm276_vm2, %v1528_v46, %v2481_v7 }
 0xf3e   :  { %v2485_v8 = vpop.permute.xlu0 %2484 }
 0xf3f   :  { %v2487_v9 = vunpack.i.h.bf16 %v2485_v8  ;;  %v2486_v10 = vunpack.i.l.bf16 %v2485_v8 }
 0xf41   :  { %v1702_v17 = vsel %vm474_vm3, %v1700_v13, %v2486_v10  ;;  %v1703_v3 = vsel %vm474_vm3, %v1701_v12, %v2487_v9  ;;  %v2173_v12 = vld [vmem:[#allocation9 + $0x1] ss:$0 sm:$0xff] }
 0xf42   :  { %v2490_v11 = vpop.permute.xlu1 %2489 }
 0xf43   :  { %v2492_v15 = vunpack.i.h.bf16 %v2490_v11  ;;  %v2491_v16 = vunpack.i.l.bf16 %v2490_v11 }
 0xf45   :  { %v1705_v18 = vsel %vm783_vm4, %v1703_v3, %v2492_v15  ;;  %v1704_v19 = vsel %vm783_vm4, %v1702_v17, %v2491_v16 }
 0xf46   :  { %v1706_v4 = vpack.c.bf16 %v1705_v18, %v1704_v19 }
 0xf48   :  { %2388 = vmatmul.mubr.msk.bf16.vlgmr.msra.gmra.mxu0 %vm204_vm1, %v1706_v4 }
 0xf49   :  { %2407 = vmatprep.mubr.msk.bf16.mxu0 %vm2801_vm0, %v2800_v0  ;;  %2400 = vmatpush3.bf16.msra.mxu0 %v2509_v43 }
 0xf4a   :  { %2401 = vmatprep.subr.bf16.mxu0 %v2800_v0 }
 0xf4d   :  { %2402 = vmatpush3.bf16.msra.mxu0 %v2510_v28 }
 0xf4e   :  { %2403 = vmatprep.subr.bf16.mxu0 %v2800_v0 }
 0xf51   :  { %2404 = vmatpush3.bf16.msra.mxu0 %v2511_v62 }
 0xf52   :  { %2405 = vmatprep.subr.bf16.mxu0 %v2800_v0 }
 0xf55   :  { %2406 = vmatpush3.bf16.msra.mxu0 %v2512_v27 }
0x1008   :  { %v1769_v21 = vpop.f32.mrf.mxu0 }
0x1009   :  { %v1770_v49 = vadd.f32 %v2151_v20, %v1769_v21 }
0x100a   :  { %v2389_v14 = vpop.f32.mrf.mxu0 }
0x100b   :  { %v1776_v54 = vadd.f32 %v1770_v49, %v3138_v29 }
0x100c   :  { %v1772_v22 = vpop.f32.mrf.mxu0 }
0x100d   :  { %v1773_v23 = vadd.f32 %v2151_v20, %v1772_v22  ;;  %v1782_v24 = vsel %vm204_vm1, %v1776_v54, 0.0 }
0x100e   :  { %1783 = vadd.xlane.f32.xlu0 %v1782_v24  ;;  %v2390_v25 = vpop.f32.mrf.mxu0 }
0x100f   :  { %v1777_v26 = vadd.f32 %v1773_v23, %v3140_v30  ;;  %v2507_v30 = vld [vmem:[%s3315_s6 + $0x18] sm:$0xff]  }
0x1010   :  { %2392 = vmatpush3.bf16.msra.mxu1 %v2507_v30 }
0x1011   :  { %v1785_v31 = vsel %vm204_vm1, %v1777_v26, 0.0  ;;  %2393 = vmatprep.subr.bf16.mxu1 %v2800_v0 }
0x1012   :  { %1786 = vadd.xlane.f32.xlu1 %v1785_v31 }
0x1014   :  { %2394 = vmatpush3.bf16.msra.mxu1 %v2508_v39 }
0x1097   :  { %v1784_v32 = vpop.xlane.xlu0 %1783 }
0x1098   :  { %v1788_v33 = vmul.f32 0.03125, %v1784_v32 }
0x109a   :  { %v1790_v35 = vsub.f32 %v1776_v54, %v1788_v33 }
0x109b   :  { %v1787_v34 = vpop.xlane.xlu1 %1786 }
0x109c   :  { %v1789_v36 = vmul.f32 0.03125, %v1787_v34  ;;  %v1792_v37 = vmul.f32 %v1790_v35, %v1790_v35 }
0x109e   :  { %v1791_v38 = vsub.f32 %v1777_v26, %v1789_v36  ;;  %v1794_v29 = vsel %vm204_vm1, %v1792_v37, 0.0 }
0x109f   :  { %1795 = vadd.xlane.f32.xlu0 %v1794_v29  ;;  %v2179_v29 = vld [vmem:[#allocation13 + $0x1] ss:$0 sm:$0xff] }
0x10a0   :  { %v1793_v40 = vmul.f32 %v1791_v38, %v1791_v38 }
0x10a2   :  { %v1797_v41 = vsel %vm204_vm1, %v1793_v40, 0.0 }
0x10a3   :  { %1798 = vadd.xlane.f32.xlu0 %v1797_v41  ;;  %v2180_v41 = vld [vmem:[#allocation15 + $0x1] ss:$0 sm:$0xff] }
0x1128   :  { %v1796_v44 = vpop.xlane.xlu0 %1795 }
0x1129   :  { %v1800_v45 = vmul.f32 0.03125, %v1796_v44 }
0x112b   :  { %v1802_v46 = vadd.f32 1e-05, %v1800_v45 }
0x112c   :  { %v1799_v47 = vpop.xlane.xlu0 %1798 }
0x112d   :  { %2585 = vrsqrt.f32 %v1802_v46  ;;  %v1801_v42 = vmul.f32 0.03125, %v1799_v47 }
0x112f   :  { %v1803_v48 = vadd.f32 1e-05, %v1801_v42 }
0x1131   :  { %2587 = vrsqrt.f32 %v1803_v48 }
0x113a   :  { %v2586_v50 = vpop.eup %2585 }
0x113b   :  { %v1806_v51 = vmul.f32 %v2586_v50, %v1790_v35 }
0x113d   :  { %v1814_v56 = vmul.f32 %v2155_v52, %v1806_v51 }
0x113e   :  { %v2588_v53 = vpop.eup %2587 }
0x113f   :  { %v1807_v55 = vmul.f32 %v2588_v53, %v1791_v38  ;;  %v1822_v59 = vadd.f32 %v2156_v57, %v1814_v56 }
0x1141   :  { %v1815_v58 = vmul.f32 %v2155_v52, %v1807_v55 }
0x1143   :  { %v1823_v60 = vadd.f32 %v2156_v57, %v1815_v58 }
0x1145   :  { %v1824_v61 = vpack.c.bf16 %v1823_v60, %v1822_v59 }
0x1147   :  { %2396 = vmatmul.mubr.msk.bf16.vlgmr.msra.gmra.mxu1 %vm204_vm1, %v1824_v61 }
0x1207   :  { %v1887_v1 = vpop.f32.mrf.mxu1 }
0x1208   :  { %v1888_v5 = vadd.f32 %v2161_v63, %v1887_v1 }
0x1209   :  { %v2397_v2 = vpop.f32.mrf.mxu1 }
0x120a   :  { %v1894_v9 = vmax.f32 %v1888_v5, 0.0  ;;  %v2181_v2 = vld [vmem:[%s3323_s14] ss:$0 sm:$0xff] }
0x120b   :  { %v1890_v6 = vpop.f32.mrf.mxu1 }
0x120c   :  { %v1891_v7 = vadd.f32 %v2161_v63, %v1890_v6  ;;  %v2182_v6 = vld [vmem:[%s3324_s15] ss:$0 sm:$0xff] }
0x120d   :  { %v2398_v8 = vpop.f32.mrf.mxu1 }
0x120e   :  { %v1895_v10 = vmax.f32 %v1891_v7, 0.0 }
0x1210   :  { %v1896_v11 = vpack.c.bf16 %v1895_v10, %v1894_v9 }
0x1212   :  { %2408 = vmatmul.mubr.msk.bf16.vlgmr.msra.gmra.mxu0 %vm1011_vm5, %v1896_v11 }
0x12d2   :  { %v1975_v13 = vpop.f32.mrf.mxu0 }
0x12d3   :  { %v1976_v0 = vadd.f32 %v2173_v12, %v1975_v13 }
0x12d4   :  { %v2409_v15 = vpop.f32.mrf.mxu0 }
0x12d5   :  { %v1982_v16 = vadd.f32 %v1976_v0, %v1822_v59 }
0x12d6   :  { %v1978_v17 = vpop.f32.mrf.mxu0 }
0x12d7   :  { %v1979_v3 = vadd.f32 %v2173_v12, %v1978_v17  ;;  %v1988_v18 = vsel %vm204_vm1, %v1982_v16, 0.0 }
0x12d8   :  { %1989 = vadd.xlane.f32.xlu1 %v1988_v18  ;;  %v2410_v19 = vpop.f32.mrf.mxu0 }
0x12d9   :  { %v1983_v4 = vadd.f32 %v1979_v3, %v1823_v60 }
0x12db   :  { %v1991_v20 = vsel %vm204_vm1, %v1983_v4, 0.0 }
0x12dc   :  { %1992 = vadd.xlane.f32.xlu0 %v1991_v20 }
0x1361   :  { %v1990_v21 = vpop.xlane.xlu1 %1989 }
0x1362   :  { %v1994_v49 = vmul.f32 0.03125, %v1990_v21 }
0x1364   :  { %v1996_v14 = vsub.f32 %v1982_v16, %v1994_v49 }
0x1365   :  { %v1993_v54 = vpop.xlane.xlu0 %1992 }
0x1366   :  { %v1995_v22 = vmul.f32 0.03125, %v1993_v54  ;;  %v1998_v23 = vmul.f32 %v1996_v14, %v1996_v14 }
0x1368   :  { %v1997_v24 = vsub.f32 %v1983_v4, %v1995_v22  ;;  %v2000_v25 = vsel %vm204_vm1, %v1998_v23, 0.0 }
0x1369   :  { %2001 = vadd.xlane.f32.xlu1 %v2000_v25 }
0x136a   :  { %v1999_v26 = vmul.f32 %v1997_v24, %v1997_v24 }
0x136c   :  { %v2003_v31 = vsel %vm204_vm1, %v1999_v26, 0.0 }
0x136d   :  { %2004 = vadd.xlane.f32.xlu0 %v2003_v31 }
0x13f2   :  { %v2002_v32 = vpop.xlane.xlu1 %2001 }
0x13f3   :  { %v2006_v33 = vmul.f32 0.03125, %v2002_v32 }
0x13f5   :  { %v2008_v35 = vadd.f32 1e-05, %v2006_v33 }
0x13f6   :  { %v2005_v34 = vpop.xlane.xlu0 %2004 }
0x13f7   :  { %2589 = vrsqrt.f32 %v2008_v35  ;;  %v2007_v36 = vmul.f32 0.03125, %v2005_v34 }
0x13f9   :  { %v2009_v37 = vadd.f32 1e-05, %v2007_v36 }
0x13fb   :  { %2591 = vrsqrt.f32 %v2009_v37 }
0x1404   :  { %v2590_v38 = vpop.eup %2589 }
0x1405   :  { %v2012_v40 = vmul.f32 %v2590_v38, %v1996_v14 }
0x1407   :  { %v2020_v30 = vmul.f32 %v2179_v29, %v2012_v40 }
0x1408   :  { %v2592_v39 = vpop.eup %2591 }
0x1409   :  { %v2028_v43 = vadd.f32 %v2180_v41, %v2020_v30  ;;  %v2013_v44 = vmul.f32 %v2592_v39, %v1997_v24 }
0x140b   :  { %v2032_v45 = vsel %vm204_vm1, %v2028_v43, 0.0  ;;  %v2021_v46 = vmul.f32 %v2179_v29, %v2013_v44 }
0x140c   :  { %2033 = vadd.xlane.f32.xlu1 %v2032_v45 }
0x140d   :  { %v2029_v47 = vadd.f32 %v2180_v41, %v2021_v46 }
0x140f   :  { %v2035_v42 = vsel %vm204_vm1, %v2029_v47, 0.0 }
0x1410   :  { %2036 = vadd.xlane.f32.xlu0 %v2035_v42 }
0x1495   :  { %v2034_v48 = vpop.xlane.xlu1 %2033 }
0x1496   :  { %v2038_v50 = vmul.f32 0.03125, %v2034_v48 }
0x1498   :  { %v2040_v51 = vsub.f32 %v2028_v43, %v2038_v50 }
0x1499   :  { %v2037_v52 = vpop.xlane.xlu0 %2036 }
0x149a   :  { %v2039_v53 = vmul.f32 0.03125, %v2037_v52  ;;  %v2042_v55 = vmul.f32 %v2040_v51, %v2040_v51 }
0x149c   :  { %v2041_v56 = vsub.f32 %v2029_v47, %v2039_v53  ;;  %v2044_v57 = vsel %vm204_vm1, %v2042_v55, 0.0 }
0x149d   :  { %2045 = vadd.xlane.f32.xlu1 %v2044_v57 }
0x149e   :  { %v2043_v58 = vmul.f32 %v2041_v56, %v2041_v56 }
0x14a0   :  { %v2047_v59 = vsel %vm204_vm1, %v2043_v58, 0.0 }
0x14a1   :  { %2048 = vadd.xlane.f32.xlu0 %v2047_v59 }
0x1526   :  { %v2046_v60 = vpop.xlane.xlu1 %2045 }
0x1527   :  { %v2050_v61 = vmul.f32 0.03125, %v2046_v60 }
0x1529   :  { %v2052_v28 = vadd.f32 1e-05, %v2050_v61 }
0x152a   :  { %v2049_v62 = vpop.xlane.xlu0 %2048 }
0x152b   :  { %2593 = vrsqrt.f32 %v2052_v28  ;;  %v2051_v27 = vmul.f32 0.03125, %v2049_v62 }
0x152d   :  { %v2053_v63 = vadd.f32 1e-05, %v2051_v27 }
0x152f   :  { %2595 = vrsqrt.f32 %v2053_v63 }
0x1538   :  { %v2594_v1 = vpop.eup %2593 }
0x1539   :  { %v2056_v5 = vmul.f32 %v2594_v1, %v2040_v51 }
0x153b   :  { %v2064_v7 = vmul.f32 %v2181_v2, %v2056_v5 }
0x153c   :  { %v2596_v8 = vpop.eup %2595 }
0x153d   :  { %v2072_v9 = vadd.f32 %v2182_v6, %v2064_v7  ;;  %v2057_v10 = vmul.f32 %v2596_v8, %v2041_v56 }
0x153f   :  { %v2075_v11 = vrot.slane %v2072_v9, 4  ;;  %v2065_v12 = vmul.f32 %v2181_v2, %v2057_v10 }
0x1541   :  { %2076 = vrot.lane.b32.xlu1 %v2075_v11, %s2808_s28  ;;  %v2073_v13 = vadd.f32 %v2182_v6, %v2065_v12 }
0x1543   :  { %2080 = vrot.lane.b32.xlu0 %v2073_v13, %s2806_s1  ;;  %v2083_v0 = vrot.slane %v2073_v13, 4 }
0x1545   :  { %2084 = vrot.lane.b32.xlu1 %v2083_v0, %s2805_s26 }
0x15b3   :  { %v2077_v15 = vpop.permute.xlu1 %2076 }
0x15b4   :  { %v2087_v16 = vsel %vm204_vm1, %v2072_v9, %v2077_v15 }
0x15b5   :  { %v2081_v17 = vpop.permute.xlu0 %2080 }
0x15b6   :  { %v2088_v3 = vsel %vm1011_vm5, %v2087_v16, %v2081_v17 }
0x15b7   :  { %v2085_v18 = vpop.permute.xlu1 %2084 }
0x15b8   :  { %v2090_v19 = vsel %vm2089_vm6, %v2088_v3, %v2085_v18 }
0x15b9   :  { %2091 = vst [vmem:[%s3325_s16] sm:$0xf] %v2090_v19 }
0x15ba   :  { %2096 = vsyncpa [#allocation3], 1 }
0x15bb   :  { %2097 = vsyncpa [#allocation5], 1 }
0x15bc   :  { %2098 = vsyncpa [#allocation8], 1 }
0x15bd   :  { %2099 = vsyncpa [#allocation11], 1 }
0x15be   :  { %2100 = vsyncpa [#allocation14], 1 }

</bundles_post_ra>
